<compile_context>
chip_gen: v5e
topology: v5e:2x2
jax: 0.10.0
libtpu: 0.0.40
codegen_flags: <defaults>
</compile_context>

<pallas_src>
import jax
import jax.numpy as jnp
from jax.experimental import pallas as pl
from jax.experimental.pallas import tpu as pltpu

CONV_KERN = 5


# ---------------------------------------------------------------------------
# Fused kernel: one grid step == one group of batch elements, all layers here.
# Activations are (C, L): channels on sublanes, length on lanes (NCL native).
# ---------------------------------------------------------------------------
def _unet_kernel(x_ref,
                 w_e1a, b_e1a, w_e1b, b_e1b,
                 w_e2a, b_e2a, w_e2b, b_e2b,
                 w_up_ev, w_up_od, b_up,
                 w_d2a, b_d2a, w_d2b, b_d2b,
                 w_out, b_out,
                 o_ref):
    f32 = jnp.float32
    K = CONV_KERN

    def sel(rows, cols, fn):
        # Tiny 0/1 selection matrix built from 2-D iota (exact in f32 matmuls).
        r = jax.lax.broadcasted_iota(jnp.int32, (rows, cols), 0)
        c = jax.lax.broadcasted_iota(jnp.int32, (rows, cols), 1)
        return fn(r, c).astype(f32)

    def conv_k5_p1(x, w_ref, b_ref, relu=True):
        # Conv1d(kernel=5, padding=1) as ONE matmul:
        #   cols[k*Cin+ci, m] = xpad[ci, m+k];  y = W2 @ cols + b
        # with W2[co, k*Cin+ci] = W_pt[co, ci, k] (prepared in the wrapper).
        cin, L = x.shape
        Lout = L + 2 - (K - 1)
        z = jnp.zeros((cin, 1), f32)
        xp = jnp.concatenate([z, x, z], axis=1)                 # (Cin, L+2)
        cols = jnp.concatenate([xp[:, k:k + Lout] for k in range(K)], axis=0)
        y = jnp.dot(w_ref[...], cols, preferred_element_type=f32) + b_ref[...]
        return jnp.maximum(y, 0.0) if relu else y

    def maxpool2(x):
        # MaxPool1d(2): even/odd column selection via 0/1 matmuls, then max.
        _, L = x.shape
        Lh = L // 2
        s_ev = sel(L, Lh, lambda r, c: r == 2 * c)
        s_od = sel(L, Lh, lambda r, c: r == 2 * c + 1)
        ev = jnp.dot(x, s_ev, preferred_element_type=f32)
        od = jnp.dot(x, s_od, preferred_element_type=f32)
        return jnp.maximum(ev, od)

    def conv_transpose_k5_s2(x, w_ev_ref, w_od_ref, b_ref):
        # ConvTranspose1d(k=5, s=2), Lout = 2L+3, WITHOUT zero-stuffing:
        #   even outputs y[:, 2m]   = W4 x[m-2] + W2 x[m-1] + W0 x[m]
        #   odd  outputs y[:, 2m+1] = W3 x[m-1] + W1 x[m]
        # each phase is one matmul; results are interleaved by selection matmuls.
        cin, L = x.shape
        Lout = 2 * L + K - 2
        Le, Lo = L + 2, L + 1
        z1 = jnp.zeros((cin, 1), f32)
        z2 = jnp.zeros((cin, 2), f32)

        xp4 = jnp.concatenate([z2, x, z2], axis=1)              # (Cin, L+4)
        cols_e = jnp.concatenate([xp4[:, t:t + Le] for t in range(3)], axis=0)
        y_ev = jnp.dot(w_ev_ref[...], cols_e, preferred_element_type=f32)  # (Cout, L+2)

        xp1 = jnp.concatenate([z1, x, z1], axis=1)              # (Cin, L+2)
        cols_o = jnp.concatenate([xp1[:, t:t + Lo] for t in range(2)], axis=0)
        y_od = jnp.dot(w_od_ref[...], cols_o, preferred_element_type=f32)  # (Cout, L+1)

        s_e = sel(Le, Lout, lambda r, c: c == 2 * r)            # even slots
        s_o = sel(Lo, Lout, lambda r, c: c == 2 * r + 1)        # odd slots
        y = (jnp.dot(y_ev, s_e, preferred_element_type=f32)
             + jnp.dot(y_od, s_o, preferred_element_type=f32))
        return y + b_ref[...]

    for b in range(x_ref.shape[0]):                  # static unroll over group
        x = x_ref[b].astype(f32)                     # (Cin, L), NCL-native
        h = conv_k5_p1(x, w_e1a, b_e1a)              # enc1
        h = conv_k5_p1(h, w_e1b, b_e1b)
        h = maxpool2(h)                              # pool
        h = conv_k5_p1(h, w_e2a, b_e2a)              # enc2
        h = conv_k5_p1(h, w_e2b, b_e2b)
        h = conv_transpose_k5_s2(h, w_up_ev, w_up_od, b_up)   # upconv2 (no ReLU)
        h = conv_k5_p1(h, w_d2a, b_d2a)              # dec2
        h = conv_k5_p1(h, w_d2b, b_d2b)
        y = jnp.dot(w_out[...], h, preferred_element_type=f32) + b_out[...]  # outconv k=1
        o_ref[b] = y.astype(o_ref.dtype)


# ---------------------------------------------------------------------------
# Wrapper
# ---------------------------------------------------------------------------
_W_NAMES = ("e1a_w", "e1a_b", "e1b_w", "e1b_b",
            "e2a_w", "e2a_b", "e2b_w", "e2b_b",
            "up_w_ev", "up_w_od", "up_b",
            "d2a_w", "d2a_b", "d2b_w", "d2b_b",
            "out_w", "out_b")


def _out_len(L, K=CONV_KERN):
    loss = (K - 1) - 2          # length lost per Conv1d(kernel=5, padding=1)
    l = L - 2 * loss            # enc1
    l = l // 2                  # pool
    l = l - 2 * loss            # enc2
    l = 2 * l + K - 2           # upconv2 (stride 2)
    l = l - 2 * loss            # dec2
    return l                    # outconv (k=1) keeps length


@jax.jit
def nikhils_unet_forward(x_ncl, kparams):
    """x_ncl: (B, Cin, L) float32, NCL exactly like the PyTorch module."""
    B, Cin, L = x_ncl.shape
    Lf = _out_len(L)
    Cout = kparams["out_w"].shape[0]

    # 2-way "parallel" grid for v7x's two TensorCores when B allows it;
    # on single-TC v5e/v6e the grid is just a short loop.
    groups = 2 if (B >= 2 and B % 2 == 0) else 1
    bpg = B // groups

    weights = [kparams[n] for n in _W_NAMES]
    w_specs = [pl.BlockSpec(tuple(w.shape), lambda i: (0, 0)) for w in weights]

    return pl.pallas_call(
        _unet_kernel,
        out_shape=jax.ShapeDtypeStruct((B, Cout, Lf), x_ncl.dtype),
        grid_spec=pltpu.PrefetchScalarGridSpec(
            num_scalar_prefetch=0,
            grid=(groups,),
            in_specs=[pl.BlockSpec((bpg, Cin, L), lambda i: (i, 0, 0))] + w_specs,
            out_specs=pl.BlockSpec((bpg, Cout, Lf), lambda i: (i, 0, 0))),
        compiler_params=pltpu.CompilerParams(
            dimension_semantics=("parallel",)),
    )(x_ncl, *weights)


# ---------------------------------------------------------------------------
# Parameters: synthetic init in PyTorch-native layouts, then one-time
# conversion to the 2-D matmul layouts the fused kernel consumes.
# ---------------------------------------------------------------------------
def init_params(key, in_channels=3, out_channels=3, base_filters=32):
    """Conv1d weights: (Cout, Cin, K); ConvTranspose1d: (Cin, Cout, K); bias: (Cout,)."""
    bf = base_filters
    conv_specs = [
        ("e1a", in_channels, bf, CONV_KERN),
        ("e1b", bf, bf, CONV_KERN),
        ("e2a", bf, 2 * bf, CONV_KERN),
        ("e2b", 2 * bf, 2 * bf, CONV_KERN),
        ("d2a", bf, bf, CONV_KERN),
        ("d2b", bf, bf, CONV_KERN),
        ("out", bf, out_channels, 1),
    ]
    params = {}
    keys = jax.random.split(key, len(conv_specs) + 1)
    for k_, (name, cin, cout, ks) in zip(keys[:-1], conv_specs):
        kw, kb = jax.random.split(k_)
        bound = 1.0 / float(cin * ks) ** 0.5
        params[name + "_w"] = jax.random.uniform(
            kw, (cout, cin, ks), jnp.float32, -bound, bound)
        params[name + "_b"] = jax.random.uniform(
            kb, (cout,), jnp.float32, -bound, bound)
    # ConvTranspose1d(2*bf -> bf, k=5, s=2): PyTorch weight layout (Cin, Cout, K).
    kw, kb = jax.random.split(keys[-1])
    cin, cout = 2 * bf, bf
    bound = 1.0 / float(cin * CONV_KERN) ** 0.5
    params["up_w"] = jax.random.uniform(
        kw, (cin, cout, CONV_KERN), jnp.float32, -bound, bound)
    params["up_b"] = jax.random.uniform(kb, (cout,), jnp.float32, -bound, bound)
    return params


def prepare_params(pt):
    """One-time re-layout of PyTorch weights into the kernel's matmul layouts."""
    def conv_w(w):                                    # (Cout, Cin, K) -> (Cout, K*Cin)
        co, ci, ks = w.shape
        return jnp.transpose(w, (0, 2, 1)).reshape(co, ks * ci)

    p = {}
    for n in ("e1a", "e1b", "e2a", "e2b", "d2a", "d2b"):
        p[n + "_w"] = conv_w(pt[n + "_w"])
        p[n + "_b"] = pt[n + "_b"].reshape(-1, 1)
    wt = pt["up_w"]                                   # (Cin, Cout, K)
    wk = [wt[:, :, k].T for k in range(CONV_KERN)]    # each (Cout, Cin)
    p["up_w_ev"] = jnp.concatenate([wk[4], wk[2], wk[0]], axis=1)   # (Cout, 3*Cin)
    p["up_w_od"] = jnp.concatenate([wk[3], wk[1]], axis=1)          # (Cout, 2*Cin)
    p["up_b"] = pt["up_b"].reshape(-1, 1)
    p["out_w"] = pt["out_w"][:, :, 0]                 # k=1 conv -> plain matmul
    p["out_b"] = pt["out_b"].reshape(-1, 1)
    return p


# ---------------------------------------------------------------------------
# Pure-JAX reference with PyTorch semantics (verification only).
# ---------------------------------------------------------------------------
def _reference_forward(x, pt):
    dn = ("NCH", "OIH", "NCH")
    hi = jax.lax.Precision.HIGHEST

    def conv(h, w, b, pad):
        y = jax.lax.conv_general_dilated(h, w, window_strides=(1,),
                                         padding=[(pad, pad)],
                                         dimension_numbers=dn, precision=hi)
        return y + b.reshape(1, -1, 1)

    h = jnp.maximum(conv(x, pt["e1a_w"], pt["e1a_b"], 1), 0.0)
    h = jnp.maximum(conv(h, pt["e1b_w"], pt["e1b_b"], 1), 0.0)
    B, C, L = h.shape
    h = jnp.max(h[:, :, :(L // 2) * 2].reshape(B, C, L // 2, 2), axis=-1)
    h = jnp.maximum(conv(h, pt["e2a_w"], pt["e2a_b"], 1), 0.0)
    h = jnp.maximum(conv(h, pt["e2b_w"], pt["e2b_b"], 1), 0.0)
    # ConvTranspose1d(k=5, s=2) == lhs-dilated conv with flipped, transposed kernel.
    w_up = jnp.flip(pt["up_w"], axis=2).transpose(1, 0, 2)      # (Cout, Cin, K)
    h = jax.lax.conv_general_dilated(h, w_up, window_strides=(1,),
                                     padding=[(CONV_KERN - 1, CONV_KERN - 1)],
                                     lhs_dilation=(2,),
                                     dimension_numbers=dn, precision=hi)
    h = h + pt["up_b"].reshape(1, -1, 1)
    h = jnp.maximum(conv(h, pt["d2a_w"], pt["d2a_b"], 1), 0.0)
    h = jnp.maximum(conv(h, pt["d2b_w"], pt["d2b_b"], 1), 0.0)
    return conv(h, pt["out_w"], pt["out_b"], 0)


# ---------------------------------------------------------------------------
if __name__ == "__main__":
    key = jax.random.PRNGKey(0)
    kx, kp = jax.random.split(key)

    B, C, L = 2, 3, 32                               # NCL, like the PyTorch module
    x = jax.random.normal(kx, (B, C, L), jnp.float32)

    pt_params = init_params(kp, in_channels=3, out_channels=3, base_filters=32)
    kparams = prepare_params(pt_params)              # one-time weight re-layout

    y = nikhils_unet_forward(x, kparams)
    y = jax.block_until_ready(y)

    assert y.shape == (B, 3, _out_len(L)), y.shape
    assert bool(jnp.all(jnp.isfinite(y)))

    # Verify against the pure-JAX reference (PyTorch Conv1d / MaxPool1d /
    # ConvTranspose1d semantics).  Tolerance covers MXU internal precision.
    y_ref = _reference_forward(x, pt_params)
    assert y_ref.shape == y.shape, (y_ref.shape, y.shape)
    err = float(jnp.max(jnp.abs(y - y_ref)))
    assert err < 3e-2, f"max abs error vs reference: {err}"

    print("KERNEL_OK")
</pallas_src>

<mosaic_0001>
module attributes {stable_mosaic.version = 11 : i64} {
  func.func @_unet_kernel(%arg0: i32, %arg1: memref<1x3x32xf32, #tpu.memory_space<vmem>>, %arg2: memref<32x15xf32, #tpu.memory_space<vmem>>, %arg3: memref<32x1xf32, #tpu.memory_space<vmem>>, %arg4: memref<32x160xf32, #tpu.memory_space<vmem>>, %arg5: memref<32x1xf32, #tpu.memory_space<vmem>>, %arg6: memref<64x160xf32, #tpu.memory_space<vmem>>, %arg7: memref<64x1xf32, #tpu.memory_space<vmem>>, %arg8: memref<64x320xf32, #tpu.memory_space<vmem>>, %arg9: memref<64x1xf32, #tpu.memory_space<vmem>>, %arg10: memref<32x192xf32, #tpu.memory_space<vmem>>, %arg11: memref<32x128xf32, #tpu.memory_space<vmem>>, %arg12: memref<32x1xf32, #tpu.memory_space<vmem>>, %arg13: memref<32x160xf32, #tpu.memory_space<vmem>>, %arg14: memref<32x1xf32, #tpu.memory_space<vmem>>, %arg15: memref<32x160xf32, #tpu.memory_space<vmem>>, %arg16: memref<32x1xf32, #tpu.memory_space<vmem>>, %arg17: memref<3x32xf32, #tpu.memory_space<vmem>>, %arg18: memref<3x1xf32, #tpu.memory_space<vmem>>, %arg19: memref<1x3x19xf32, #tpu.memory_space<vmem>>) attributes {dimension_semantics = [#tpu.dimension_semantics<parallel>], iteration_bounds = array<i64: 2>, scalar_prefetch = 0 : i64, scratch_operands = 0 : i64, tpu.core_type = #tpu.core_type<tc>, window_params = [{transform_indices = @transform_0, window_bounds = array<i64: 1, 3, 32>}, {pipeline_mode = #tpu.pipeline_mode<synchronous>, transform_indices = @transform_1, window_bounds = array<i64: 32, 15>}, {pipeline_mode = #tpu.pipeline_mode<synchronous>, transform_indices = @transform_2, window_bounds = array<i64: 32, 1>}, {pipeline_mode = #tpu.pipeline_mode<synchronous>, transform_indices = @transform_3, window_bounds = array<i64: 32, 160>}, {pipeline_mode = #tpu.pipeline_mode<synchronous>, transform_indices = @transform_4, window_bounds = array<i64: 32, 1>}, {pipeline_mode = #tpu.pipeline_mode<synchronous>, transform_indices = @transform_5, window_bounds = array<i64: 64, 160>}, {pipeline_mode = #tpu.pipeline_mode<synchronous>, transform_indices = @transform_6, window_bounds = array<i64: 64, 1>}, {pipeline_mode = #tpu.pipeline_mode<synchronous>, transform_indices = @transform_7, window_bounds = array<i64: 64, 320>}, {pipeline_mode = #tpu.pipeline_mode<synchronous>, transform_indices = @transform_8, window_bounds = array<i64: 64, 1>}, {pipeline_mode = #tpu.pipeline_mode<synchronous>, transform_indices = @transform_9, window_bounds = array<i64: 32, 192>}, {pipeline_mode = #tpu.pipeline_mode<synchronous>, transform_indices = @transform_10, window_bounds = array<i64: 32, 128>}, {pipeline_mode = #tpu.pipeline_mode<synchronous>, transform_indices = @transform_11, window_bounds = array<i64: 32, 1>}, {pipeline_mode = #tpu.pipeline_mode<synchronous>, transform_indices = @transform_12, window_bounds = array<i64: 32, 160>}, {pipeline_mode = #tpu.pipeline_mode<synchronous>, transform_indices = @transform_13, window_bounds = array<i64: 32, 1>}, {pipeline_mode = #tpu.pipeline_mode<synchronous>, transform_indices = @transform_14, window_bounds = array<i64: 32, 160>}, {pipeline_mode = #tpu.pipeline_mode<synchronous>, transform_indices = @transform_15, window_bounds = array<i64: 32, 1>}, {pipeline_mode = #tpu.pipeline_mode<synchronous>, transform_indices = @transform_16, window_bounds = array<i64: 3, 32>}, {pipeline_mode = #tpu.pipeline_mode<synchronous>, transform_indices = @transform_17, window_bounds = array<i64: 3, 1>}, {transform_indices = @transform_18, window_bounds = array<i64: 1, 3, 19>}]} {
    %c0 = arith.constant 0 : index
    %c0_0 = arith.constant 0 : index
    %c0_1 = arith.constant 0 : index
    %0 = vector.load %arg1[%c0, %c0_0, %c0_1] : memref<1x3x32xf32, #tpu.memory_space<vmem>>, vector<1x3x32xf32>
    %1 = vector.shape_cast %0 : vector<1x3x32xf32> to vector<3x32xf32>
    %cst = arith.constant 0.000000e+00 : f32
    %2 = vector.broadcast %cst : f32 to vector<3x1xf32>
    %3 = tpu.concatenate %2, %1, %2 in 1 : vector<3x1xf32>, vector<3x32xf32>, vector<3x1xf32> -> vector<3x34xf32>
    %4 = vector.extract_strided_slice %3 {offsets = [0, 0], sizes = [3, 30], strides = [1, 1]} : vector<3x34xf32> to vector<3x30xf32>
    %5 = vector.extract_strided_slice %3 {offsets = [0, 1], sizes = [3, 30], strides = [1, 1]} : vector<3x34xf32> to vector<3x30xf32>
    %6 = vector.extract_strided_slice %3 {offsets = [0, 2], sizes = [3, 30], strides = [1, 1]} : vector<3x34xf32> to vector<3x30xf32>
    %7 = vector.extract_strided_slice %3 {offsets = [0, 3], sizes = [3, 30], strides = [1, 1]} : vector<3x34xf32> to vector<3x30xf32>
    %8 = vector.extract_strided_slice %3 {offsets = [0, 4], sizes = [3, 30], strides = [1, 1]} : vector<3x34xf32> to vector<3x30xf32>
    %9 = tpu.concatenate %4, %5, %6, %7, %8 in 0 : vector<3x30xf32>, vector<3x30xf32>, vector<3x30xf32>, vector<3x30xf32>, vector<3x30xf32> -> vector<15x30xf32>
    %c0_2 = arith.constant 0 : index
    %c0_3 = arith.constant 0 : index
    %10 = vector.load %arg2[%c0_2, %c0_3] : memref<32x15xf32, #tpu.memory_space<vmem>>, vector<32x15xf32>
    %cst_4 = arith.constant dense<0.000000e+00> : vector<32x30xf32>
    %11 = tpu.matmul %10, %9, %cst_4 {dimension_numbers = #tpu.dot_dimension_numbers<[1], [0], [0], [1], [0, 0, 1, 1], [], []>} : vector<32x15xf32>, vector<15x30xf32>, vector<32x30xf32> -> vector<32x30xf32>
    %c0_5 = arith.constant 0 : index
    %c0_6 = arith.constant 0 : index
    %12 = vector.load %arg3[%c0_5, %c0_6] : memref<32x1xf32, #tpu.memory_space<vmem>>, vector<32x1xf32>
    %13 = vector.broadcast %12 : vector<32x1xf32> to vector<32x30xf32>
    %14 = arith.addf %11, %13 : vector<32x30xf32>
    %cst_7 = arith.constant 0.000000e+00 : f32
    %15 = vector.broadcast %cst_7 : f32 to vector<32x30xf32>
    %16 = arith.maximumf %14, %15 : vector<32x30xf32>
    %cst_8 = arith.constant 0.000000e+00 : f32
    %17 = vector.broadcast %cst_8 : f32 to vector<32x1xf32>
    %18 = tpu.concatenate %17, %16, %17 in 1 : vector<32x1xf32>, vector<32x30xf32>, vector<32x1xf32> -> vector<32x32xf32>
    %19 = vector.extract_strided_slice %18 {offsets = [0, 0], sizes = [32, 28], strides = [1, 1]} : vector<32x32xf32> to vector<32x28xf32>
    %20 = vector.extract_strided_slice %18 {offsets = [0, 1], sizes = [32, 28], strides = [1, 1]} : vector<32x32xf32> to vector<32x28xf32>
    %21 = vector.extract_strided_slice %18 {offsets = [0, 2], sizes = [32, 28], strides = [1, 1]} : vector<32x32xf32> to vector<32x28xf32>
    %22 = vector.extract_strided_slice %18 {offsets = [0, 3], sizes = [32, 28], strides = [1, 1]} : vector<32x32xf32> to vector<32x28xf32>
    %23 = vector.extract_strided_slice %18 {offsets = [0, 4], sizes = [32, 28], strides = [1, 1]} : vector<32x32xf32> to vector<32x28xf32>
    %24 = tpu.concatenate %19, %20, %21, %22, %23 in 0 : vector<32x28xf32>, vector<32x28xf32>, vector<32x28xf32>, vector<32x28xf32>, vector<32x28xf32> -> vector<160x28xf32>
    %c0_9 = arith.constant 0 : index
    %c0_10 = arith.constant 0 : index
    %25 = vector.load %arg4[%c0_9, %c0_10] : memref<32x160xf32, #tpu.memory_space<vmem>>, vector<32x160xf32>
    %cst_11 = arith.constant dense<0.000000e+00> : vector<32x28xf32>
    %26 = tpu.matmul %25, %24, %cst_11 {dimension_numbers = #tpu.dot_dimension_numbers<[1], [0], [0], [1], [0, 0, 1, 1], [], []>} : vector<32x160xf32>, vector<160x28xf32>, vector<32x28xf32> -> vector<32x28xf32>
    %c0_12 = arith.constant 0 : index
    %c0_13 = arith.constant 0 : index
    %27 = vector.load %arg5[%c0_12, %c0_13] : memref<32x1xf32, #tpu.memory_space<vmem>>, vector<32x1xf32>
    %28 = vector.broadcast %27 : vector<32x1xf32> to vector<32x28xf32>
    %29 = arith.addf %26, %28 : vector<32x28xf32>
    %cst_14 = arith.constant 0.000000e+00 : f32
    %30 = vector.broadcast %cst_14 : f32 to vector<32x28xf32>
    %31 = arith.maximumf %29, %30 : vector<32x28xf32>
    %32 = tpu.iota {dimensions = array<i32: 0>} : vector<28x14xi32>
    %33 = tpu.iota {dimensions = array<i32: 1>} : vector<28x14xi32>
    %c2_i32 = arith.constant 2 : i32
    %34 = vector.broadcast %c2_i32 : i32 to vector<28x14xi32>
    %35 = arith.muli %34, %33 : vector<28x14xi32>
    %36 = arith.cmpi eq, %32, %35 : vector<28x14xi32>
    %37 = arith.extui %36 : vector<28x14xi1> to vector<28x14xi32>
    %38 = arith.sitofp %37 : vector<28x14xi32> to vector<28x14xf32>
    %39 = tpu.iota {dimensions = array<i32: 0>} : vector<28x14xi32>
    %40 = tpu.iota {dimensions = array<i32: 1>} : vector<28x14xi32>
    %c2_i32_15 = arith.constant 2 : i32
    %41 = vector.broadcast %c2_i32_15 : i32 to vector<28x14xi32>
    %42 = arith.muli %41, %40 : vector<28x14xi32>
    %c1_i32 = arith.constant 1 : i32
    %43 = vector.broadcast %c1_i32 : i32 to vector<28x14xi32>
    %44 = arith.addi %42, %43 : vector<28x14xi32>
    %45 = arith.cmpi eq, %39, %44 : vector<28x14xi32>
    %46 = arith.extui %45 : vector<28x14xi1> to vector<28x14xi32>
    %47 = arith.sitofp %46 : vector<28x14xi32> to vector<28x14xf32>
    %cst_16 = arith.constant dense<0.000000e+00> : vector<32x14xf32>
    %48 = tpu.matmul %31, %38, %cst_16 {dimension_numbers = #tpu.dot_dimension_numbers<[1], [0], [0], [1], [0, 0, 1, 1], [], []>} : vector<32x28xf32>, vector<28x14xf32>, vector<32x14xf32> -> vector<32x14xf32>
    %cst_17 = arith.constant dense<0.000000e+00> : vector<32x14xf32>
    %49 = tpu.matmul %31, %47, %cst_17 {dimension_numbers = #tpu.dot_dimension_numbers<[1], [0], [0], [1], [0, 0, 1, 1], [], []>} : vector<32x28xf32>, vector<28x14xf32>, vector<32x14xf32> -> vector<32x14xf32>
    %50 = arith.maximumf %48, %49 : vector<32x14xf32>
    %cst_18 = arith.constant 0.000000e+00 : f32
    %51 = vector.broadcast %cst_18 : f32 to vector<32x1xf32>
    %52 = tpu.concatenate %51, %50, %51 in 1 : vector<32x1xf32>, vector<32x14xf32>, vector<32x1xf32> -> vector<32x16xf32>
    %53 = vector.extract_strided_slice %52 {offsets = [0, 0], sizes = [32, 12], strides = [1, 1]} : vector<32x16xf32> to vector<32x12xf32>
    %54 = vector.extract_strided_slice %52 {offsets = [0, 1], sizes = [32, 12], strides = [1, 1]} : vector<32x16xf32> to vector<32x12xf32>
    %55 = vector.extract_strided_slice %52 {offsets = [0, 2], sizes = [32, 12], strides = [1, 1]} : vector<32x16xf32> to vector<32x12xf32>
    %56 = vector.extract_strided_slice %52 {offsets = [0, 3], sizes = [32, 12], strides = [1, 1]} : vector<32x16xf32> to vector<32x12xf32>
    %57 = vector.extract_strided_slice %52 {offsets = [0, 4], sizes = [32, 12], strides = [1, 1]} : vector<32x16xf32> to vector<32x12xf32>
    %58 = tpu.concatenate %53, %54, %55, %56, %57 in 0 : vector<32x12xf32>, vector<32x12xf32>, vector<32x12xf32>, vector<32x12xf32>, vector<32x12xf32> -> vector<160x12xf32>
    %c0_19 = arith.constant 0 : index
    %c0_20 = arith.constant 0 : index
    %59 = vector.load %arg6[%c0_19, %c0_20] : memref<64x160xf32, #tpu.memory_space<vmem>>, vector<64x160xf32>
    %cst_21 = arith.constant dense<0.000000e+00> : vector<64x12xf32>
    %60 = tpu.matmul %59, %58, %cst_21 {dimension_numbers = #tpu.dot_dimension_numbers<[1], [0], [0], [1], [0, 0, 1, 1], [], []>} : vector<64x160xf32>, vector<160x12xf32>, vector<64x12xf32> -> vector<64x12xf32>
    %c0_22 = arith.constant 0 : index
    %c0_23 = arith.constant 0 : index
    %61 = vector.load %arg7[%c0_22, %c0_23] : memref<64x1xf32, #tpu.memory_space<vmem>>, vector<64x1xf32>
    %62 = vector.broadcast %61 : vector<64x1xf32> to vector<64x12xf32>
    %63 = arith.addf %60, %62 : vector<64x12xf32>
    %cst_24 = arith.constant 0.000000e+00 : f32
    %64 = vector.broadcast %cst_24 : f32 to vector<64x12xf32>
    %65 = arith.maximumf %63, %64 : vector<64x12xf32>
    %cst_25 = arith.constant 0.000000e+00 : f32
    %66 = vector.broadcast %cst_25 : f32 to vector<64x1xf32>
    %67 = tpu.concatenate %66, %65, %66 in 1 : vector<64x1xf32>, vector<64x12xf32>, vector<64x1xf32> -> vector<64x14xf32>
    %68 = vector.extract_strided_slice %67 {offsets = [0, 0], sizes = [64, 10], strides = [1, 1]} : vector<64x14xf32> to vector<64x10xf32>
    %69 = vector.extract_strided_slice %67 {offsets = [0, 1], sizes = [64, 10], strides = [1, 1]} : vector<64x14xf32> to vector<64x10xf32>
    %70 = vector.extract_strided_slice %67 {offsets = [0, 2], sizes = [64, 10], strides = [1, 1]} : vector<64x14xf32> to vector<64x10xf32>
    %71 = vector.extract_strided_slice %67 {offsets = [0, 3], sizes = [64, 10], strides = [1, 1]} : vector<64x14xf32> to vector<64x10xf32>
    %72 = vector.extract_strided_slice %67 {offsets = [0, 4], sizes = [64, 10], strides = [1, 1]} : vector<64x14xf32> to vector<64x10xf32>
    %73 = tpu.concatenate %68, %69, %70, %71, %72 in 0 : vector<64x10xf32>, vector<64x10xf32>, vector<64x10xf32>, vector<64x10xf32>, vector<64x10xf32> -> vector<320x10xf32>
    %c0_26 = arith.constant 0 : index
    %c0_27 = arith.constant 0 : index
    %74 = vector.load %arg8[%c0_26, %c0_27] : memref<64x320xf32, #tpu.memory_space<vmem>>, vector<64x320xf32>
    %cst_28 = arith.constant dense<0.000000e+00> : vector<64x10xf32>
    %75 = tpu.matmul %74, %73, %cst_28 {dimension_numbers = #tpu.dot_dimension_numbers<[1], [0], [0], [1], [0, 0, 1, 1], [], []>} : vector<64x320xf32>, vector<320x10xf32>, vector<64x10xf32> -> vector<64x10xf32>
    %c0_29 = arith.constant 0 : index
    %c0_30 = arith.constant 0 : index
    %76 = vector.load %arg9[%c0_29, %c0_30] : memref<64x1xf32, #tpu.memory_space<vmem>>, vector<64x1xf32>
    %77 = vector.broadcast %76 : vector<64x1xf32> to vector<64x10xf32>
    %78 = arith.addf %75, %77 : vector<64x10xf32>
    %cst_31 = arith.constant 0.000000e+00 : f32
    %79 = vector.broadcast %cst_31 : f32 to vector<64x10xf32>
    %80 = arith.maximumf %78, %79 : vector<64x10xf32>
    %cst_32 = arith.constant 0.000000e+00 : f32
    %81 = vector.broadcast %cst_32 : f32 to vector<64x1xf32>
    %cst_33 = arith.constant 0.000000e+00 : f32
    %82 = vector.broadcast %cst_33 : f32 to vector<64x2xf32>
    %83 = tpu.concatenate %82, %80, %82 in 1 : vector<64x2xf32>, vector<64x10xf32>, vector<64x2xf32> -> vector<64x14xf32>
    %84 = vector.extract_strided_slice %83 {offsets = [0, 0], sizes = [64, 12], strides = [1, 1]} : vector<64x14xf32> to vector<64x12xf32>
    %85 = vector.extract_strided_slice %83 {offsets = [0, 1], sizes = [64, 12], strides = [1, 1]} : vector<64x14xf32> to vector<64x12xf32>
    %86 = vector.extract_strided_slice %83 {offsets = [0, 2], sizes = [64, 12], strides = [1, 1]} : vector<64x14xf32> to vector<64x12xf32>
    %87 = tpu.concatenate %84, %85, %86 in 0 : vector<64x12xf32>, vector<64x12xf32>, vector<64x12xf32> -> vector<192x12xf32>
    %c0_34 = arith.constant 0 : index
    %c0_35 = arith.constant 0 : index
    %88 = vector.load %arg10[%c0_34, %c0_35] : memref<32x192xf32, #tpu.memory_space<vmem>>, vector<32x192xf32>
    %cst_36 = arith.constant dense<0.000000e+00> : vector<32x12xf32>
    %89 = tpu.matmul %88, %87, %cst_36 {dimension_numbers = #tpu.dot_dimension_numbers<[1], [0], [0], [1], [0, 0, 1, 1], [], []>} : vector<32x192xf32>, vector<192x12xf32>, vector<32x12xf32> -> vector<32x12xf32>
    %90 = tpu.concatenate %81, %80, %81 in 1 : vector<64x1xf32>, vector<64x10xf32>, vector<64x1xf32> -> vector<64x12xf32>
    %91 = vector.extract_strided_slice %90 {offsets = [0, 0], sizes = [64, 11], strides = [1, 1]} : vector<64x12xf32> to vector<64x11xf32>
    %92 = vector.extract_strided_slice %90 {offsets = [0, 1], sizes = [64, 11], strides = [1, 1]} : vector<64x12xf32> to vector<64x11xf32>
    %93 = tpu.concatenate %91, %92 in 0 : vector<64x11xf32>, vector<64x11xf32> -> vector<128x11xf32>
    %c0_37 = arith.constant 0 : index
    %c0_38 = arith.constant 0 : index
    %94 = vector.load %arg11[%c0_37, %c0_38] : memref<32x128xf32, #tpu.memory_space<vmem>>, vector<32x128xf32>
    %cst_39 = arith.constant dense<0.000000e+00> : vector<32x11xf32>
    %95 = tpu.matmul %94, %93, %cst_39 {dimension_numbers = #tpu.dot_dimension_numbers<[1], [0], [0], [1], [0, 0, 1, 1], [], []>} : vector<32x128xf32>, vector<128x11xf32>, vector<32x11xf32> -> vector<32x11xf32>
    %96 = tpu.iota {dimensions = array<i32: 0>} : vector<12x23xi32>
    %97 = tpu.iota {dimensions = array<i32: 1>} : vector<12x23xi32>
    %c2_i32_40 = arith.constant 2 : i32
    %98 = vector.broadcast %c2_i32_40 : i32 to vector<12x23xi32>
    %99 = arith.muli %98, %96 : vector<12x23xi32>
    %100 = arith.cmpi eq, %97, %99 : vector<12x23xi32>
    %101 = arith.extui %100 : vector<12x23xi1> to vector<12x23xi32>
    %102 = arith.sitofp %101 : vector<12x23xi32> to vector<12x23xf32>
    %103 = tpu.iota {dimensions = array<i32: 0>} : vector<11x23xi32>
    %104 = tpu.iota {dimensions = array<i32: 1>} : vector<11x23xi32>
    %c2_i32_41 = arith.constant 2 : i32
    %105 = vector.broadcast %c2_i32_41 : i32 to vector<11x23xi32>
    %106 = arith.muli %105, %103 : vector<11x23xi32>
    %c1_i32_42 = arith.constant 1 : i32
    %107 = vector.broadcast %c1_i32_42 : i32 to vector<11x23xi32>
    %108 = arith.addi %106, %107 : vector<11x23xi32>
    %109 = arith.cmpi eq, %104, %108 : vector<11x23xi32>
    %110 = arith.extui %109 : vector<11x23xi1> to vector<11x23xi32>
    %111 = arith.sitofp %110 : vector<11x23xi32> to vector<11x23xf32>
    %cst_43 = arith.constant dense<0.000000e+00> : vector<32x23xf32>
    %112 = tpu.matmul %89, %102, %cst_43 {dimension_numbers = #tpu.dot_dimension_numbers<[1], [0], [0], [1], [0, 0, 1, 1], [], []>} : vector<32x12xf32>, vector<12x23xf32>, vector<32x23xf32> -> vector<32x23xf32>
    %cst_44 = arith.constant dense<0.000000e+00> : vector<32x23xf32>
    %113 = tpu.matmul %95, %111, %cst_44 {dimension_numbers = #tpu.dot_dimension_numbers<[1], [0], [0], [1], [0, 0, 1, 1], [], []>} : vector<32x11xf32>, vector<11x23xf32>, vector<32x23xf32> -> vector<32x23xf32>
    %114 = arith.addf %112, %113 : vector<32x23xf32>
    %c0_45 = arith.constant 0 : index
    %c0_46 = arith.constant 0 : index
    %115 = vector.load %arg12[%c0_45, %c0_46] : memref<32x1xf32, #tpu.memory_space<vmem>>, vector<32x1xf32>
    %116 = vector.broadcast %115 : vector<32x1xf32> to vector<32x23xf32>
    %117 = arith.addf %114, %116 : vector<32x23xf32>
    %cst_47 = arith.constant 0.000000e+00 : f32
    %118 = vector.broadcast %cst_47 : f32 to vector<32x1xf32>
    %119 = tpu.concatenate %118, %117, %118 in 1 : vector<32x1xf32>, vector<32x23xf32>, vector<32x1xf32> -> vector<32x25xf32>
    %120 = vector.extract_strided_slice %119 {offsets = [0, 0], sizes = [32, 21], strides = [1, 1]} : vector<32x25xf32> to vector<32x21xf32>
    %121 = vector.extract_strided_slice %119 {offsets = [0, 1], sizes = [32, 21], strides = [1, 1]} : vector<32x25xf32> to vector<32x21xf32>
    %122 = vector.extract_strided_slice %119 {offsets = [0, 2], sizes = [32, 21], strides = [1, 1]} : vector<32x25xf32> to vector<32x21xf32>
    %123 = vector.extract_strided_slice %119 {offsets = [0, 3], sizes = [32, 21], strides = [1, 1]} : vector<32x25xf32> to vector<32x21xf32>
    %124 = vector.extract_strided_slice %119 {offsets = [0, 4], sizes = [32, 21], strides = [1, 1]} : vector<32x25xf32> to vector<32x21xf32>
    %125 = tpu.concatenate %120, %121, %122, %123, %124 in 0 : vector<32x21xf32>, vector<32x21xf32>, vector<32x21xf32>, vector<32x21xf32>, vector<32x21xf32> -> vector<160x21xf32>
    %c0_48 = arith.constant 0 : index
    %c0_49 = arith.constant 0 : index
    %126 = vector.load %arg13[%c0_48, %c0_49] : memref<32x160xf32, #tpu.memory_space<vmem>>, vector<32x160xf32>
    %cst_50 = arith.constant dense<0.000000e+00> : vector<32x21xf32>
    %127 = tpu.matmul %126, %125, %cst_50 {dimension_numbers = #tpu.dot_dimension_numbers<[1], [0], [0], [1], [0, 0, 1, 1], [], []>} : vector<32x160xf32>, vector<160x21xf32>, vector<32x21xf32> -> vector<32x21xf32>
    %c0_51 = arith.constant 0 : index
    %c0_52 = arith.constant 0 : index
    %128 = vector.load %arg14[%c0_51, %c0_52] : memref<32x1xf32, #tpu.memory_space<vmem>>, vector<32x1xf32>
    %129 = vector.broadcast %128 : vector<32x1xf32> to vector<32x21xf32>
    %130 = arith.addf %127, %129 : vector<32x21xf32>
    %cst_53 = arith.constant 0.000000e+00 : f32
    %131 = vector.broadcast %cst_53 : f32 to vector<32x21xf32>
    %132 = arith.maximumf %130, %131 : vector<32x21xf32>
    %cst_54 = arith.constant 0.000000e+00 : f32
    %133 = vector.broadcast %cst_54 : f32 to vector<32x1xf32>
    %134 = tpu.concatenate %133, %132, %133 in 1 : vector<32x1xf32>, vector<32x21xf32>, vector<32x1xf32> -> vector<32x23xf32>
    %135 = vector.extract_strided_slice %134 {offsets = [0, 0], sizes = [32, 19], strides = [1, 1]} : vector<32x23xf32> to vector<32x19xf32>
    %136 = vector.extract_strided_slice %134 {offsets = [0, 1], sizes = [32, 19], strides = [1, 1]} : vector<32x23xf32> to vector<32x19xf32>
    %137 = vector.extract_strided_slice %134 {offsets = [0, 2], sizes = [32, 19], strides = [1, 1]} : vector<32x23xf32> to vector<32x19xf32>
    %138 = vector.extract_strided_slice %134 {offsets = [0, 3], sizes = [32, 19], strides = [1, 1]} : vector<32x23xf32> to vector<32x19xf32>
    %139 = vector.extract_strided_slice %134 {offsets = [0, 4], sizes = [32, 19], strides = [1, 1]} : vector<32x23xf32> to vector<32x19xf32>
    %140 = tpu.concatenate %135, %136, %137, %138, %139 in 0 : vector<32x19xf32>, vector<32x19xf32>, vector<32x19xf32>, vector<32x19xf32>, vector<32x19xf32> -> vector<160x19xf32>
    %c0_55 = arith.constant 0 : index
    %c0_56 = arith.constant 0 : index
    %141 = vector.load %arg15[%c0_55, %c0_56] : memref<32x160xf32, #tpu.memory_space<vmem>>, vector<32x160xf32>
    %cst_57 = arith.constant dense<0.000000e+00> : vector<32x19xf32>
    %142 = tpu.matmul %141, %140, %cst_57 {dimension_numbers = #tpu.dot_dimension_numbers<[1], [0], [0], [1], [0, 0, 1, 1], [], []>} : vector<32x160xf32>, vector<160x19xf32>, vector<32x19xf32> -> vector<32x19xf32>
    %c0_58 = arith.constant 0 : index
    %c0_59 = arith.constant 0 : index
    %143 = vector.load %arg16[%c0_58, %c0_59] : memref<32x1xf32, #tpu.memory_space<vmem>>, vector<32x1xf32>
    %144 = vector.broadcast %143 : vector<32x1xf32> to vector<32x19xf32>
    %145 = arith.addf %142, %144 : vector<32x19xf32>
    %cst_60 = arith.constant 0.000000e+00 : f32
    %146 = vector.broadcast %cst_60 : f32 to vector<32x19xf32>
    %147 = arith.maximumf %145, %146 : vector<32x19xf32>
    %c0_61 = arith.constant 0 : index
    %c0_62 = arith.constant 0 : index
    %148 = vector.load %arg17[%c0_61, %c0_62] : memref<3x32xf32, #tpu.memory_space<vmem>>, vector<3x32xf32>
    %cst_63 = arith.constant dense<0.000000e+00> : vector<3x19xf32>
    %149 = tpu.matmul %148, %147, %cst_63 {dimension_numbers = #tpu.dot_dimension_numbers<[1], [0], [0], [1], [0, 0, 1, 1], [], []>} : vector<3x32xf32>, vector<32x19xf32>, vector<3x19xf32> -> vector<3x19xf32>
    %c0_64 = arith.constant 0 : index
    %c0_65 = arith.constant 0 : index
    %150 = vector.load %arg18[%c0_64, %c0_65] : memref<3x1xf32, #tpu.memory_space<vmem>>, vector<3x1xf32>
    %151 = vector.broadcast %150 : vector<3x1xf32> to vector<3x19xf32>
    %152 = arith.addf %149, %151 : vector<3x19xf32>
    %c0_66 = arith.constant 0 : index
    %c0_67 = arith.constant 0 : index
    %c0_68 = arith.constant 0 : index
    %153 = vector.load %arg19[%c0_66, %c0_67, %c0_68] : memref<1x3x19xf32, #tpu.memory_space<vmem>>, vector<1x3x19xf32>
    %154 = vector.shape_cast %153 : vector<1x3x19xf32> to vector<3x19xf32>
    %155 = vector.shape_cast %152 : vector<3x19xf32> to vector<1x3x19xf32>
    tpu.vector_store %arg19[%c0_66, %c0_67, %c0_68], %155 {strides = array<i32>} : memref<1x3x19xf32, #tpu.memory_space<vmem>>, vector<1x3x19xf32>,
    return
  }
  func.func @transform_0(%arg0: i32) -> (i32, i32, i32) {
    %c0_i32 = arith.constant 0 : i32
    %c0_i32_0 = arith.constant 0 : i32
    %c0_i32_1 = arith.constant 0 : i32
    return %arg0, %c0_i32, %c0_i32_0 : i32, i32, i32
  }
  func.func @transform_1(%arg0: i32) -> (i32, i32) {
    %c0_i32 = arith.constant 0 : i32
    %c0_i32_0 = arith.constant 0 : i32
    %c0_i32_1 = arith.constant 0 : i32
    return %c0_i32, %c0_i32_0 : i32, i32
  }
  func.func @transform_2(%arg0: i32) -> (i32, i32) {
    %c0_i32 = arith.constant 0 : i32
    %c0_i32_0 = arith.constant 0 : i32
    %c0_i32_1 = arith.constant 0 : i32
    return %c0_i32, %c0_i32_0 : i32, i32
  }
  func.func @transform_3(%arg0: i32) -> (i32, i32) {
    %c0_i32 = arith.constant 0 : i32
    %c0_i32_0 = arith.constant 0 : i32
    %c0_i32_1 = arith.constant 0 : i32
    return %c0_i32, %c0_i32_0 : i32, i32
  }
  func.func @transform_4(%arg0: i32) -> (i32, i32) {
    %c0_i32 = arith.constant 0 : i32
    %c0_i32_0 = arith.constant 0 : i32
    %c0_i32_1 = arith.constant 0 : i32
    return %c0_i32, %c0_i32_0 : i32, i32
  }
  func.func @transform_5(%arg0: i32) -> (i32, i32) {
    %c0_i32 = arith.constant 0 : i32
    %c0_i32_0 = arith.constant 0 : i32
    %c0_i32_1 = arith.constant 0 : i32
    return %c0_i32, %c0_i32_0 : i32, i32
  }
  func.func @transform_6(%arg0: i32) -> (i32, i32) {
    %c0_i32 = arith.constant 0 : i32
    %c0_i32_0 = arith.constant 0 : i32
    %c0_i32_1 = arith.constant 0 : i32
    return %c0_i32, %c0_i32_0 : i32, i32
  }
  func.func @transform_7(%arg0: i32) -> (i32, i32) {
    %c0_i32 = arith.constant 0 : i32
    %c0_i32_0 = arith.constant 0 : i32
    %c0_i32_1 = arith.constant 0 : i32
    return %c0_i32, %c0_i32_0 : i32, i32
  }
  func.func @transform_8(%arg0: i32) -> (i32, i32) {
    %c0_i32 = arith.constant 0 : i32
    %c0_i32_0 = arith.constant 0 : i32
    %c0_i32_1 = arith.constant 0 : i32
    return %c0_i32, %c0_i32_0 : i32, i32
  }
  func.func @transform_9(%arg0: i32) -> (i32, i32) {
    %c0_i32 = arith.constant 0 : i32
    %c0_i32_0 = arith.constant 0 : i32
    %c0_i32_1 = arith.constant 0 : i32
    return %c0_i32, %c0_i32_0 : i32, i32
  }
  func.func @transform_10(%arg0: i32) -> (i32, i32) {
    %c0_i32 = arith.constant 0 : i32
    %c0_i32_0 = arith.constant 0 : i32
    %c0_i32_1 = arith.constant 0 : i32
    return %c0_i32, %c0_i32_0 : i32, i32
  }
  func.func @transform_11(%arg0: i32) -> (i32, i32) {
    %c0_i32 = arith.constant 0 : i32
    %c0_i32_0 = arith.constant 0 : i32
    %c0_i32_1 = arith.constant 0 : i32
    return %c0_i32, %c0_i32_0 : i32, i32
  }
  func.func @transform_12(%arg0: i32) -> (i32, i32) {
    %c0_i32 = arith.constant 0 : i32
    %c0_i32_0 = arith.constant 0 : i32
    %c0_i32_1 = arith.constant 0 : i32
    return %c0_i32, %c0_i32_0 : i32, i32
  }
  func.func @transform_13(%arg0: i32) -> (i32, i32) {
    %c0_i32 = arith.constant 0 : i32
    %c0_i32_0 = arith.constant 0 : i32
    %c0_i32_1 = arith.constant 0 : i32
    return %c0_i32, %c0_i32_0 : i32, i32
  }
  func.func @transform_14(%arg0: i32) -> (i32, i32) {
    %c0_i32 = arith.constant 0 : i32
    %c0_i32_0 = arith.constant 0 : i32
    %c0_i32_1 = arith.constant 0 : i32
    return %c0_i32, %c0_i32_0 : i32, i32
  }
  func.func @transform_15(%arg0: i32) -> (i32, i32) {
    %c0_i32 = arith.constant 0 : i32
    %c0_i32_0 = arith.constant 0 : i32
    %c0_i32_1 = arith.constant 0 : i32
    return %c0_i32, %c0_i32_0 : i32, i32
  }
  func.func @transform_16(%arg0: i32) -> (i32, i32) {
    %c0_i32 = arith.constant 0 : i32
    %c0_i32_0 = arith.constant 0 : i32
    %c0_i32_1 = arith.constant 0 : i32
    return %c0_i32, %c0_i32_0 : i32, i32
  }
  func.func @transform_17(%arg0: i32) -> (i32, i32) {
    %c0_i32 = arith.constant 0 : i32
    %c0_i32_0 = arith.constant 0 : i32
    %c0_i32_1 = arith.constant 0 : i32
    return %c0_i32, %c0_i32_0 : i32, i32
  }
  func.func @transform_18(%arg0: i32) -> (i32, i32, i32) {
    %c0_i32 = arith.constant 0 : i32
    %c0_i32_0 = arith.constant 0 : i32
    %c0_i32_1 = arith.constant 0 : i32
    return %arg0, %c0_i32, %c0_i32_0 : i32, i32, i32
  }
}

</mosaic_0001>

<bundles_post_ra>
// kernel: nikhils_unet_forward.1
= control target key start
LH: loop header
LB: loop body
LE: loop exit
PB: predicated region body
PF: predicated region fallthrough
CT: control target
= control target key end

     0   :  { %s4123_s0 = inlined_call_operand.vmem [shape: f32[2,3,32], index: 0, kind: input, shape index: {}]   ;;  %s4124_s1 = inlined_call_operand.vmem [shape: f32[32,15], index: 1, kind: input, shape index: {}]   ;;  %s4125_s2 = inlined_call_operand.vmem [shape: f32[32,1], index: 2, kind: input, shape index: {}]   ;;  %s4126_s3 = inlined_call_operand.vmem [shape: f32[32,160], index: 3, kind: input, shape index: {}]   ;;  %s4127_s4 = inlined_call_operand.vmem [shape: f32[32,1], index: 4, kind: input, shape index: {}]   ;;  %s4128_s5 = inlined_call_operand.vmem [shape: f32[64,160], index: 5, kind: input, shape index: {}]   ;;  %s4129_s6 = inlined_call_operand.vmem [shape: f32[64,1], index: 6, kind: input, shape index: {}]   ;;  %s4130_s7 = inlined_call_operand.hbm [shape: f32[64,320], index: 7, kind: input, shape index: {}]   ;;  %s4131_s8 = inlined_call_operand.vmem [shape: f32[64,1], index: 8, kind: input, shape index: {}]   ;;  %s4132_s9 = inlined_call_operand.vmem [shape: f32[32,192], index: 9, kind: input, shape index: {}]   ;;  %s4133_s10 = inlined_call_operand.hbm [shape: f32[32,128], index: 10, kind: input, shape index: {}]   ;;  %s4134_s11 = inlined_call_operand.vmem [shape: f32[32,1], index: 11, kind: input, shape index: {}]   ;;  %s4135_s12 = inlined_call_operand.vmem [shape: f32[32,160], index: 12, kind: input, shape index: {}]   ;;  %s4136_s13 = inlined_call_operand.vmem [shape: f32[32,1], index: 13, kind: input, shape index: {}]   ;;  %s4137_s14 = inlined_call_operand.hbm [shape: f32[32,160], index: 14, kind: input, shape index: {}]   ;;  %s4138_s15 = inlined_call_operand.vmem [shape: f32[32,1], index: 15, kind: input, shape index: {}]   ;;  %s4139_s16 = inlined_call_operand.vmem [shape: f32[3,32], index: 16, kind: input, shape index: {}]   ;;  %s4140_s17 = inlined_call_operand.vmem [shape: f32[3,1], index: 17, kind: input, shape index: {}]   ;;  %s4141_s18 = inlined_call_operand.vmem [shape: f32[2,3,19], index: 18, kind: output, shape index: {}]  }
   0x1   :  { %4145 = sst [smem:[#allocation10_spill]] %s4123_s0 }
   0x2   :  { %4146 = sst [smem:[#allocation11_spill]] %s4124_s1 }
   0x3   :  { %4147 = sst [smem:[#allocation12_spill]] %s4125_s2 }
   0x4   :  { %4148 = sst [smem:[#allocation13_spill]] %s4130_s7 }
   0x5   :  { %4149 = sst [smem:[#allocation14_spill]] %s4133_s10 }
   0x6   :  { %4150 = sst [smem:[#allocation15_spill]] %s4139_s16 }
   0x7   :  { %4151 = sst [smem:[#allocation16_spill]] %s4141_s18 }
   0x8   :  { %23 = vsyncpa [#allocation3], 0 }
   0x9   :  { %24 = vsyncpa [#allocation5], 0  ;;  %s3311_s27 = smov 0  }
   0xa LB: > { %4152 = sst [smem:[#allocation9_spill]] %s3196_s27  ;;  %s3320_s0 = sadd.s32 4294967295, %s3196_s27   ;;  %s3196_s27 = sphi %s3311_s27, %s30_s27  }
   0xb   : > { %s4153_s10 = sld [smem:[#allocation14_spill]]  ;;  %p2572_p0 = scmp.ge.s32.totalorder %s3196_s27, 1 }
   0xc   : > { %p444_p1 = scmp.lt.s32.totalorder %s3196_s27, 3  ;;  %p2757_p2 = scmp.eq.s32.totalorder %s3320_s0, 0 }
   0xd   : > { %s3198_s1 = smov [#allocation4]   ;;  %s4155_s7 = sld [smem:[#allocation13_spill]] }
   0xe   : > { %p3325_p3 = pnand %p2572_p0, %p444_p1  ;;  %s495_s20 = sshll.u32 %s3198_s1, 4  ;;  %s496_s20 = int_to_ptr.vmem [resolvable:$true] %s495_s20 }
   0xf   : > { %s3199_s24 = smov [#allocation2]   ;;  %s3200_s26 = smov 128  }
  0x10   : > { %p2747_p4 = pneg %p3325_p3  ;;  %s475_s25 = sshll.u32 %s3199_s24, 4  ;;  %s476_s25 = int_to_ptr.vmem [resolvable:$true] %s475_s25 }
  0x11   : > { %s493_s30 = sshll.u32 %s4153_s10, 4  ;;  %s3201_s28 = smov 8   ;;  %s494_s30 = int_to_ptr.hbm [resolvable:$true] %s493_s30 }
  0x12   : > { %p3336_p5 = pnand %p2757_p2, %p2747_p4  ;;  %s516_s21 = sshll.u32 %s4137_s14, 4  ;;  %s517_s21 = int_to_ptr.hbm [resolvable:$true] %s516_s21 }
  0x13   : > { %s473_s2 = sshll.u32 %s4155_s7, 4  ;;  %s3202_s22 = smov 384   ;;  %s474_s2 = int_to_ptr.hbm [resolvable:$true] %s473_s2 }
  0x14   : > { %2753 = dma.hbm_to_vmem [thread:$0]  (!%p3336_p5), %s494_s30, 512, %s496_s20, [#allocation5], %s3200_s26, %s3200_s26, %s3201_s28  }
  0x15   : > { %s3203_s7 = smov 24   ;;  %s3204_s10 = smov [#allocation6]  }
  0x16   : > { %2750 = dma.hbm_to_vmem [thread:$0]  (!%p3336_p5), %s474_s2, 3072, %s476_s25, [#allocation3], %s3202_s22, %s3202_s22, %s3203_s7  }
  0x17   : > { %s518_s27 = sshll.u32 %s3204_s10, 4  ;;  %s3205_s18 = smov 256   ;;  %s519_s27 = int_to_ptr.vmem [resolvable:$true] %s518_s27 }
  0x18   : > { %s3206_s16 = smov 16   ;;  %550 = sbr.rel (%p3325_p3) target bundleno = 3482 (0xd9a), region = 92 }
  0x19   : > { %2756 = dma.hbm_to_vmem [thread:$0]  (!%p3336_p5), %s517_s21, 1024, %s519_s27, [#allocation5], %s3205_s18, %s3205_s18, %s3206_s16  }
  0x1d   : > { %3187 = dma.done.wait (%p2757_p2), [#allocation3], 3072  }
  0x1e   : > { %3189 = vsyncadd (%p2757_p2), [#allocation3], 4294964224 }
  0x1f   : > { %3191 = dma.done.wait (%p2757_p2), [#allocation5], 1536  }
  0x20   : > { %3193 = vsyncadd (%p2757_p2), [#allocation5], 4294965760  ;;  %p613_p6 = scmp.lt.s32.totalorder %s3320_s0, 1  ;;  %s4157_s18 = sld [smem:[#allocation10_spill]]  ;;  %vm626_vm0 = vcmask 7168   ;;  %vm628_vm1 = vcmask 269312  }
  0x21   : > { %s3207_s30 = smov 1   ;;  %s3208_s19 = smov 125   ;;  %v3212_v9 = vmov 0   ;;  %vm651_vm2 = vcmask 1040384   ;;  %vm653_vm3 = vcmask 1043456   ;;  %vm647_vm4 = vcmask 1042432  }
  0x22   : > { %s4164_s0 = smov (!%p613_p6, %s3320_s0), 1  ;;  %s3209_s20 = smov 126   ;;  %2791 = vset.pattern.permute.xlu1 %v3212_v9  ;;  %2790 = vset.pattern.permute.xlu0 %v3212_v9  ;;  %vm696_vm5 = vcmask 1046528   ;;  %vm649_vm6 = vcmask 1045504   ;;  %vm683_vm7 = vcmask 121856   ;;  %vm753_vm8 = vcmask 252928  }
  0x23   : > { %s2581_s7 = sshll.u32 %s4164_s0, 2  ;;  %s3210_s2 = smov 127   ;;  %2789 = vset.pattern.permute.xlu2 %v3212_v9  ;;  %v818_v55 = vld [vmem:[%s4127_s4] sm:$0xff]  ;;  %v821_v56 = vld [vmem:[%s4127_s4 + $0x18] sm:$0xff]  ;;  %v819_v57 = vld [vmem:[%s4127_s4 + $0x8] sm:$0xff]  ;;  %vm842_vm9 = vcmask 261120  }
  0x24   : > { %s3211_s23 = smov 124   ;;  %s4158_s26 = sld [smem:[#allocation12_spill]]  ;;  %v820_v58 = vld [vmem:[%s4127_s4 + $0x10] sm:$0xff] }
  0x25   : > { %s4159_s16 = sld [smem:[#allocation11_spill]]  ;;  %s3215_s1 = smov 2  }
  0x26   : > { %s616_s27 = scalar_lea.vmem %s4157_s18, %s2581_s7  ;;  %s4160_s24 = sld [smem:[#allocation15_spill]] }
  0x27   : > { %v621_v0 = vld [vmem:[%s616_s27] sm:$0x7] }
  0x28   : > { %623 = vrot.lane.b32.xlu0 %v621_v0, %s3207_s30 }
  0x2a   : > { %v660_v8 = vld [vmem:[%s4158_s26 + $0x8] sm:$0xff]  ;;  %v661_v12 = vld [vmem:[%s4158_s26 + $0x10] sm:$0xff]  ;;  %v662_v13 = vld [vmem:[%s4158_s26 + $0x18] sm:$0xff] }
  0x2b   : > { %v655_v19 = vld [vmem:[%s4159_s16] sm:$0xff]  ;;  %v656_v22 = vld [vmem:[%s4159_s16 + $0x8] sm:$0xff]  ;;  %v657_v23 = vld [vmem:[%s4159_s16 + $0x10] sm:$0xff] }
  0x2c   : > { %v659_v21 = vld [vmem:[%s4158_s26] sm:$0xff]  ;;  %v658_v24 = vld [vmem:[%s4159_s16 + $0x18] sm:$0xff] }
  0x9a   : > { %v624_v1 = vpop.permute.xlu0 %623 }
  0x9b   : > { %v627_v2 = vsel %vm626_vm0, 0.0, %v624_v1 }
  0x9c   : > { %v629_v3 = vsel %vm628_vm1, %v627_v2, 0.0 }
  0x9d   : > { %v639_v4 = vrot.slane %v629_v3, 7  ;;  %v635_v5 = vrot.slane %v629_v3, 2  ;;  %v631_v6 = vrot.slane %v629_v3, 5  ;;  %v643_v7 = vrot.slane %v629_v3, 4 }
  0x9f   : > { %640 = vrot.lane.b32.xlu1 %v639_v4, %s3208_s19  ;;  %636 = vrot.lane.b32.xlu0 %v635_v5, %s3209_s20 }
  0xa0   : > { %632 = vrot.lane.b32.xlu2 %v631_v6, %s3210_s2 }
  0xa7   : > { %644 = vrot.lane.b32.xlu1 %v643_v7, %s3211_s23  ;;  %675 = vperm.xlu0 %2790, %v661_v12  }
  0xa8   : > { %680 = vperm.xlu2 %2789, %v662_v13  }
  0xaf   : > { %670 = vperm.xlu1 %2791, %v660_v8  }
  0xb0   : > { %665 = vperm.xlu2 %2789, %v659_v21   ;;  %v813_v21 = vld [vmem:[%s4126_s3 + $0x18] sm:$0xff] }
  0xfa   : > { %v633_v14 = vpop.permute.xlu2 %632 }
  0xfb   : > { %v648_v18 = vsel %vm647_vm4, %v629_v3, %v633_v14 }
 0x102   : > { %v681_v33 = vpop.permute.xlu2 %680 }
 0x10a   : > { %v666_v38 = vpop.permute.xlu2 %665 }
 0x111   : > { %v641_v10 = vpop.permute.xlu1 %640  ;;  %v637_v11 = vpop.permute.xlu0 %636 }
 0x112   : > { %v652_v15 = vsel %vm651_vm2, %v637_v11, %v641_v10  ;;  %v650_v20 = vsel %vm649_vm6, %v648_v18, %v637_v11  ;;  %vm1325_vm6 = vcmask 105472  }
 0x119   : > { %v645_v16 = vpop.permute.xlu1 %644  ;;  %v676_v30 = vpop.permute.xlu0 %675 }
 0x11a   : > { %v654_v17 = vsel %vm653_vm3, %v652_v15, %v645_v16 }
 0x11b   : > { %2583 = vmatpush.msk.msra.mxu0 %vm696_vm5, %v654_v17  ;;  %vm950_vm5 = vcmask 228352  }
 0x11d   : > { %715 = vmatpush.msra.mxu0 %v650_v20  ;;  %v810_v20 = vld [vmem:[%s4126_s3] sm:$0xff] }
 0x11e   : > { %2584 = vmatmul.msk.f32.vlgmr.msra.gmra.mxu0 %vm683_vm7, %v655_v19  ;;  %v811_v19 = vld [vmem:[%s4126_s3 + $0x8] sm:$0xff] }
 0x121   : > { %v671_v26 = vpop.permute.xlu1 %670 }
 0x126   : > { %2585 = vmatmul.msk.f32.gmra.mxu0 %vm683_vm7, %v656_v22  ;;  %v812_v22 = vld [vmem:[%s4126_s3 + $0x10] sm:$0xff] }
 0x12e   : > { %2586 = vmatmul.msk.f32.gmra.mxu0 %vm683_vm7, %v657_v23  ;;  %v815_v23 = vld [vmem:[%s4126_s3 + $0x28] sm:$0xff] }
 0x136   : > { %2587 = vmatmul.msk.f32.gmra.mxu0 %vm683_vm7, %v658_v24  ;;  %v814_v24 = vld [vmem:[%s4126_s3 + $0x20] sm:$0xff] }
 0x19b   : > { %v717_v25 = vpop.f32.mrf.mxu0 }
 0x19c   : > { %v718_v39 = vadd.f32 %v717_v25, %v666_v38  ;;  %v817_v25 = vld [vmem:[%s4126_s3 + $0x38] sm:$0xff]  ;;  %v3214_v38 = vmov 1.0  }
 0x19e   : > { %v729_v40 = vmax.f32 %v718_v39, 0.0 }
 0x1a3   : > { %v720_v27 = vpop.f32.mrf.mxu0 }
 0x1a4   : > { %v721_v28 = vadd.f32 %v720_v27, %v671_v26  ;;  %v816_v26 = vld [vmem:[%s4126_s3 + $0x30] sm:$0xff]  ;;  %v917_v27 = vlaneseq }
 0x1a6   : > { %v730_v29 = vmax.f32 %v721_v28, 0.0  ;;  %v3485_v28 = vand.u32 127, %v917_v27 }
 0x1a8   : > { %739 = vrot.lane.b32.xlu0 %v730_v29, %s3207_s30  ;;  %v3487_v29 = vshrl.u32 %v917_v27, 7  ;;  %v1127_v27 = vld [vmem:[%s4129_s6 + $0x20] sm:$0xff] }
 0x1ab   : > { %v723_v31 = vpop.f32.mrf.mxu0 }
 0x1ac   : > { %v724_v32 = vadd.f32 %v723_v31, %v676_v30  ;;  %v924_v30 = vmul.u32 2, %v3485_v28  ;;  %v921_v31 = vadd.s32 24, %v3487_v29 }
 0x1ae   : > { %v731_v34 = vmax.f32 %v724_v32, 0.0  ;;  %v937_v32 = vadd.s32 1, %v924_v30  ;;  %vm928_vm10 = vcmp.eq.s32.totalorder %v921_v31, %v924_v30  ;;  %vm925_vm1 = vcmp.eq.s32.totalorder %v3487_v29, %v924_v30 }
 0x1b0   : > { %741 = vrot.lane.b32.xlu2 %v731_v34, %s3207_s30  ;;  %vm941_vm11 = vcmp.eq.s32.totalorder %v921_v31, %v937_v32  ;;  %vm938_vm2 = vcmp.eq.s32.totalorder %v3487_v29, %v937_v32  ;;  %v1125_v31 = vld [vmem:[%s4129_s6 + $0x10] sm:$0xff] }
 0x1b3   : > { %v726_v35 = vpop.f32.mrf.mxu0 }
 0x1b4   : > { %v727_v36 = vadd.f32 %v726_v35, %v681_v33  ;;  %v3213_v33 = vmov 0.0  }
 0x1b5   : > { %v2599_v34 = vsel %vm928_vm10, 1.0, %v3213_v33  ;;  %v2603_v35 = vsel %vm941_vm11, 1.0, %v3213_v33  ;;  %vm1707_vm10 = vcmask 97280   ;;  %vm1882_vm11 = vcmask 89088  }
 0x1b6   : > { %v732_v37 = vmax.f32 %v727_v36, 0.0  ;;  %v920_v36 = vadd.s32 16, %v3487_v29  ;;  %2604 = vmatpush.msk.msra.mxu3 %vm653_vm3, %v2599_v34  ;;  %2612 = vmatpush.msk.msrb.mxu0 %vm653_vm3, %v2603_v35  ;;  %v1126_v34 = vld [vmem:[%s4129_s6 + $0x18] sm:$0xff]  ;;  %v1123_v35 = vld [vmem:[%s4129_s6] sm:$0xff] }
 0x1b8   : > { %743 = vrot.lane.b32.xlu1 %v732_v37, %s3207_s30  ;;  %vm927_vm12 = vcmp.eq.s32.totalorder %v920_v36, %v924_v30  ;;  %vm940_vm13 = vcmp.eq.s32.totalorder %v920_v36, %v937_v32  ;;  %v3497_v37 = vadd.s32 8, %v3487_v29 }
 0x1b9   : > { %2605 = vmatpush.msk.msra.mxu3 %vm927_vm12, %v3214_v38  ;;  %2613 = vmatpush.msk.msrb.mxu0 %vm940_vm13, %v3214_v38 }
 0x1ba   : > { %vm926_vm14 = vcmp.eq.s32.totalorder %v3497_v37, %v924_v30  ;;  %vm939_vm15 = vcmp.eq.s32.totalorder %v3497_v37, %v937_v32  ;;  %v1129_v30 = vld [vmem:[%s4129_s6 + $0x30] sm:$0xff]  ;;  %v1124_v32 = vld [vmem:[%s4129_s6 + $0x8] sm:$0xff] }
 0x1bb   : > { %2606 = vmatpush.msk.msra.mxu3 %vm926_vm14, %v3214_v38  ;;  %2614 = vmatpush.msk.msrb.mxu0 %vm939_vm15, %v3214_v38  ;;  %vm2291_vm15 = vcmask 179200  }
 0x1bd   : > { %2607 = vmatpush.msk.msra.mxu3 %vm925_vm1, %v3214_v38  ;;  %2615 = vmatpush.msk.msrb.mxu0 %vm938_vm2, %v3214_v38 }
 0x1c0   : > { %737 = vrot.lane.b32.xlu1 %v729_v40, %s3207_s30 }
 0x20a   : > { %v742_v41 = vpop.permute.xlu2 %741 }
 0x20b   : > { %v3410_v42 = vsel %vm626_vm0, 0.0, %v742_v41 }
 0x20c   : > { %v756_v45 = vsel %vm753_vm8, %v3410_v42, 0.0 }
 0x21a   : > { %v740_v48 = vpop.permute.xlu0 %739 }
 0x21b   : > { %v3422_v49 = vsel %vm626_vm0, 0.0, %v740_v48 }
 0x21c   : > { %v755_v52 = vsel %vm753_vm8, %v3422_v49, 0.0 }
 0x22a   : > { %v744_v43 = vpop.permute.xlu1 %743 }
 0x22b   : > { %v3413_v44 = vsel %vm626_vm0, 0.0, %v744_v43 }
 0x22c   : > { %v757_v46 = vsel %vm753_vm8, %v3413_v44, 0.0 }
 0x22d   : > { %v2802_v47 = vpack.i.bf16 %v756_v45, %v757_v46 }
 0x22f   : > { %2803 = vrot.lane.b32.xlu1 %v2802_v47, %s3209_s20  ;;  %2793 = vrot.lane.b32.xlu2 %v2802_v47, %s3208_s19 }
 0x232   : > { %v738_v50 = vpop.permute.xlu1 %737 }
 0x233   : > { %v3425_v51 = vsel %vm626_vm0, 0.0, %v738_v50 }
 0x234   : > { %v754_v53 = vsel %vm753_vm8, %v3425_v51, 0.0 }
 0x235   : > { %v2797_v54 = vpack.i.bf16 %v754_v53, %v755_v52 }
 0x237   : > { %2798 = vrot.lane.b32.xlu0 %v2797_v54, %s3208_s19  ;;  %2813 = vrot.lane.b32.xlu1 %v2797_v54, %s3210_s2 }
 0x238   : > { %2808 = vrot.lane.b32.xlu2 %v2797_v54, %s3209_s20 }
 0x23f   : > { %2818 = vrot.lane.b32.xlu0 %v2802_v47, %s3210_s2  ;;  %824 = vperm.xlu1 %2791, %v818_v55  }
 0x240   : > { %2823 = vrot.lane.b32.xlu2 %v2802_v47, %s3211_s23 }
 0x247   : > { %2828 = vrot.lane.b32.xlu0 %v2797_v54, %s3211_s23  ;;  %839 = vperm.xlu1 %2791, %v821_v56  }
 0x248   : > { %829 = vperm.xlu2 %2789, %v819_v57  }
 0x24f   : > { %834 = vperm.xlu0 %2790, %v820_v58  }
 0x289   : > { %v2794_v59 = vpop.permute.xlu2 %2793 }
 0x28a   : > { %v2795_v60 = vunpack.i.l.bf16 %v2794_v59  ;;  %v2796_v61 = vunpack.i.h.bf16 %v2794_v59 }
 0x28c   : > { %855 = vmatpush.msra.mxu1 %v2795_v60 }
 0x28e   : > { %856 = vmatpush.msra.mxu1 %v2796_v61 }
 0x292   : > { %v2809_v62 = vpop.permute.xlu2 %2808 }
 0x293   : > { %v2810_v9 = vunpack.i.l.bf16 %v2809_v62  ;;  %v2811_v10 = vunpack.i.h.bf16 %v2809_v62 }
 0x29a   : > { %v2824_v63 = vpop.permute.xlu2 %2823 }
 0x29b   : > { %v2825_v0 = vunpack.i.l.bf16 %v2824_v63  ;;  %v2826_v1 = vunpack.i.h.bf16 %v2824_v63 }
 0x29d   : > { %896 = vmatpush.msra.mxu2 %v2825_v0 }
 0x29f   : > { %897 = vmatpush.msra.mxu2 %v2826_v1 }
 0x2a1   : > { %v2804_v4 = vpop.permute.xlu1 %2803 }
 0x2a2   : > { %v2805_v6 = vunpack.i.l.bf16 %v2804_v4  ;;  %v2806_v7 = vunpack.i.h.bf16 %v2804_v4  ;;  %v830_v46 = vpop.permute.xlu2 %829 }
 0x2a9   : > { %v2799_v2 = vpop.permute.xlu0 %2798  ;;  %v2814_v12 = vpop.permute.xlu1 %2813 }
 0x2aa   : > { %v2800_v3 = vunpack.i.l.bf16 %v2799_v2  ;;  %v2801_v5 = vunpack.i.h.bf16 %v2799_v2  ;;  %v2815_v15 = vunpack.i.l.bf16 %v2814_v12  ;;  %v2816_v17 = vunpack.i.h.bf16 %v2814_v12 }
 0x2ac   : > { %857 = vmatpush.msra.mxu1 %v2800_v3 }
 0x2ae   : > { %858 = vmatpush.msra.mxu1 %v2801_v5 }
 0x2b0   : > { %859 = vmatpush.msra.mxu1 %v2805_v6 }
 0x2b1   : > { %v2819_v8 = vpop.permute.xlu0 %2818  ;;  %v825_v40 = vpop.permute.xlu1 %824 }
 0x2b2   : > { %860 = vmatpush.msra.mxu1 %v2806_v7  ;;  %v2820_v11 = vunpack.i.l.bf16 %v2819_v8  ;;  %v2821_v13 = vunpack.i.h.bf16 %v2819_v8 }
 0x2b4   : > { %861 = vmatpush.msra.mxu1 %v2810_v9 }
 0x2b6   : > { %862 = vmatpush.msra.mxu1 %v2811_v10 }
 0x2b8   : > { %863 = vmatpush.msra.mxu1 %v2820_v11 }
 0x2b9   : > { %v2829_v14 = vpop.permute.xlu0 %2828  ;;  %v840_v57 = vpop.permute.xlu1 %839 }
 0x2ba   : > { %864 = vmatpush.msra.mxu1 %v2821_v13  ;;  %v2830_v16 = vunpack.i.l.bf16 %v2829_v14  ;;  %v2831_v18 = vunpack.i.h.bf16 %v2829_v14 }
 0x2bc   : > { %865 = vmatpush.msra.mxu1 %v2815_v15  ;;  %898 = vmatpush.msra.mxu2 %v2830_v16 }
 0x2be   : > { %866 = vmatpush.msra.mxu1 %v2816_v17  ;;  %899 = vmatpush.msra.mxu2 %v2831_v18 }
 0x2bf   : > { %2592 = vmatmul.msk.f32.vlgmr.msra.gmra.mxu2 %vm842_vm9, %v811_v19 }
 0x2c0   : > { %2588 = vmatpush.msk.msra.mxu1 %vm753_vm8, %v3413_v44 }
 0x2c1   : > { %v835_v52 = vpop.permute.xlu0 %834 }
 0x2c2   : > { %2589 = vmatpush.msk.msra.mxu1 %vm753_vm8, %v3410_v42 }
 0x2c4   : > { %2590 = vmatpush.msk.msra.mxu1 %vm753_vm8, %v3422_v49 }
 0x2c6   : > { %2591 = vmatpush.msk.msra.mxu1 %vm753_vm8, %v3425_v51  ;;  %vm1698_vm8 = vcmask 15360  }
 0x2c7   : > { %871 = vmatmul.f32.vlgmr.msra.gmra.mxu1 %v810_v20  ;;  %2593 = vmatmul.msk.f32.gmra.mxu2 %vm842_vm9, %v813_v21 }
 0x2cf   : > { %874 = vmatmul.f32.gmra.mxu1 %v812_v22  ;;  %2594 = vmatmul.msk.f32.gmra.mxu2 %vm842_vm9, %v815_v23 }
 0x2d7   : > { %877 = vmatmul.f32.gmra.mxu1 %v814_v24  ;;  %2595 = vmatmul.msk.f32.gmra.mxu2 %vm842_vm9, %v817_v25  ;;  %v1130_v25 = vld [vmem:[%s4129_s6 + $0x38] sm:$0xff] }
 0x2df   : > { %880 = vmatmul.f32.gmra.mxu1 %v816_v26  ;;  %v1128_v26 = vld [vmem:[%s4129_s6 + $0x28] sm:$0xff] }
 0x342   : > { %v901_v39 = vpop.f32.mrf.mxu2 }
 0x344   : > { %v872_v41 = vpop.f32.mrf.mxu1 }
 0x345   : > { %v873_v42 = vadd.f32 %v872_v41, %v825_v40 }
 0x347   : > { %v902_v43 = vadd.f32 %v901_v39, %v873_v42 }
 0x349   : > { %v913_v44 = vmax.f32 %v902_v43, 0.0 }
 0x34a   : > { %v904_v45 = vpop.f32.mrf.mxu2 }
 0x34b   : > { %2608 = vmatmul.msk.f32.vlgmr.msra.gmra.mxu3 %vm950_vm5, %v913_v44  ;;  %2616 = vmatmul.msk.f32.vlgmr.msrb.gmra.mxu0 %vm950_vm5, %v913_v44 }
 0x34c   : > { %v875_v47 = vpop.f32.mrf.mxu1 }
 0x34d   : > { %v876_v48 = vadd.f32 %v875_v47, %v830_v46 }
 0x34f   : > { %v905_v49 = vadd.f32 %v904_v45, %v876_v48 }
 0x351   : > { %v914_v50 = vmax.f32 %v905_v49, 0.0 }
 0x352   : > { %v907_v51 = vpop.f32.mrf.mxu2 }
 0x353   : > { %2609 = vmatmul.msk.f32.gmra.mxu3 %vm950_vm5, %v914_v50  ;;  %2617 = vmatmul.msk.f32.gmra.mxu0 %vm950_vm5, %v914_v50 }
 0x354   : > { %v878_v53 = vpop.f32.mrf.mxu1 }
 0x355   : > { %v879_v54 = vadd.f32 %v878_v53, %v835_v52 }
 0x357   : > { %v908_v55 = vadd.f32 %v907_v51, %v879_v54 }
 0x359   : > { %v915_v56 = vmax.f32 %v908_v55, 0.0 }
 0x35a   : > { %v910_v59 = vpop.f32.mrf.mxu2 }
 0x35b   : > { %2610 = vmatmul.msk.f32.gmra.mxu3 %vm950_vm5, %v915_v56  ;;  %2618 = vmatmul.msk.f32.gmra.mxu0 %vm950_vm5, %v915_v56 }
 0x35c   : > { %v881_v58 = vpop.f32.mrf.mxu1 }
 0x35d   : > { %v882_v60 = vadd.f32 %v881_v58, %v840_v57  ;;  %v1107_v57 = vld [vmem:[%s4128_s5] sm:$0xff]  ;;  %v1121_v58 = vld [vmem:[%s4128_s5 + $0x70] sm:$0xff] }
 0x35f   : > { %v911_v61 = vadd.f32 %v910_v59, %v882_v60 }
 0x361   : > { %v916_v62 = vmax.f32 %v911_v61, 0.0 }
 0x363   : > { %2611 = vmatmul.msk.f32.gmra.mxu3 %vm950_vm5, %v916_v62  ;;  %2619 = vmatmul.msk.f32.gmra.mxu0 %vm950_vm5, %v916_v62 }
 0x3c8   : > { %v1015_v63 = vpop.f32.mrf.mxu0 }
 0x3ce   : > { %v983_v0 = vpop.f32.mrf.mxu3 }
 0x3cf   : > { %v1027_v10 = vmax.f32 %v983_v0, %v1015_v63  ;;  %v1109_v0 = vld [vmem:[%s4128_s5 + $0x10] sm:$0xff] }
 0x3d0   : > { %v1018_v1 = vpop.f32.mrf.mxu0 }
 0x3d6   : > { %v986_v2 = vpop.f32.mrf.mxu3 }
 0x3d7   : > { %v1028_v3 = vmax.f32 %v986_v2, %v1018_v1  ;;  %v1108_v1 = vld [vmem:[%s4128_s5 + $0x8] sm:$0xff]  ;;  %v1111_v2 = vld [vmem:[%s4128_s5 + $0x20] sm:$0xff] }
 0x3d8   : > { %v1021_v4 = vpop.f32.mrf.mxu0 }
 0x3d9   : > { %1037 = vrot.lane.b32.xlu1 %v1028_v3, %s3207_s30  ;;  %v1110_v3 = vld [vmem:[%s4128_s5 + $0x18] sm:$0xff] }
 0x3de   : > { %v989_v5 = vpop.f32.mrf.mxu3 }
 0x3df   : > { %v1029_v6 = vmax.f32 %v989_v5, %v1021_v4  ;;  %v1113_v4 = vld [vmem:[%s4128_s5 + $0x30] sm:$0xff]  ;;  %v1112_v5 = vld [vmem:[%s4128_s5 + $0x28] sm:$0xff] }
 0x3e0   : > { %v1024_v7 = vpop.f32.mrf.mxu0 }
 0x3e1   : > { %1039 = vrot.lane.b32.xlu0 %v1029_v6, %s3207_s30  ;;  %v1115_v6 = vld [vmem:[%s4128_s5 + $0x40] sm:$0xff] }
 0x3e6   : > { %v992_v8 = vpop.f32.mrf.mxu3 }
 0x3e7   : > { %v1030_v9 = vmax.f32 %v992_v8, %v1024_v7  ;;  %v1114_v7 = vld [vmem:[%s4128_s5 + $0x38] sm:$0xff]  ;;  %v1117_v8 = vld [vmem:[%s4128_s5 + $0x50] sm:$0xff] }
 0x3e9   : > { %1041 = vrot.lane.b32.xlu2 %v1030_v9, %s3207_s30  ;;  %v1116_v9 = vld [vmem:[%s4128_s5 + $0x48] sm:$0xff] }
 0x3f1   : > { %1035 = vrot.lane.b32.xlu2 %v1027_v10, %s3207_s30  ;;  %v1119_v10 = vld [vmem:[%s4128_s5 + $0x60] sm:$0xff] }
 0x443   : > { %v1042_v11 = vpop.permute.xlu2 %1041 }
 0x444   : > { %v3533_v19 = vsel %vm626_vm0, 0.0, %v1042_v11  ;;  %v1118_v11 = vld [vmem:[%s4128_s5 + $0x58] sm:$0xff] }
 0x445   : > { %v1054_v22 = vsel %vm683_vm7, %v3533_v19, 0.0 }
 0x44b   : > { %v1038_v12 = vpop.permute.xlu1 %1037  ;;  %v1036_v13 = vpop.permute.xlu2 %1035 }
 0x44c   : > { %v3522_v14 = vsel %vm626_vm0, 0.0, %v1038_v12  ;;  %v3525_v15 = vsel %vm626_vm0, 0.0, %v1036_v13  ;;  %v1120_v12 = vld [vmem:[%s4128_s5 + $0x68] sm:$0xff]  ;;  %v1122_v13 = vld [vmem:[%s4128_s5 + $0x78] sm:$0xff] }
 0x44d   : > { %v1052_v16 = vsel %vm683_vm7, %v3522_v14, 0.0  ;;  %v1051_v17 = vsel %vm683_vm7, %v3525_v15, 0.0 }
 0x44e   : > { %v2837_v18 = vpack.i.bf16 %v1051_v17, %v1052_v16 }
 0x450   : > { %2838 = vrot.lane.b32.xlu1 %v2837_v18, %s3208_s19 }
 0x453   : > { %v1040_v20 = vpop.permute.xlu0 %1039 }
 0x454   : > { %v3536_v21 = vsel %vm626_vm0, 0.0, %v1040_v20 }
 0x455   : > { %v1053_v23 = vsel %vm683_vm7, %v3536_v21, 0.0 }
 0x456   : > { %v2842_v24 = vpack.i.bf16 %v1053_v23, %v1054_v22 }
 0x458   : > { %2843 = vrot.lane.b32.xlu2 %v2842_v24, %s3209_s20  ;;  %2833 = vrot.lane.b32.xlu0 %v2842_v24, %s3208_s19 }
 0x459   : > { %2853 = vrot.lane.b32.xlu1 %v2842_v24, %s3210_s2 }
 0x460   : > { %2858 = vrot.lane.b32.xlu2 %v2837_v18, %s3210_s2  ;;  %2848 = vrot.lane.b32.xlu0 %v2837_v18, %s3209_s20 }
 0x461   : > { %2868 = vrot.lane.b32.xlu1 %v2837_v18, %s3211_s23 }
 0x468   : > { %1168 = vperm.xlu2 %2789, %v1130_v25   ;;  %2863 = vrot.lane.b32.xlu0 %v2842_v24, %s3211_s23 }
 0x469   : > { %1158 = vperm.xlu1 %2791, %v1128_v26  }
 0x470   : > { %1153 = vperm.xlu2 %2789, %v1127_v27   ;;  %1163 = vperm.xlu0 %2790, %v1129_v30  }
 0x471   : > { %1143 = vperm.xlu1 %2791, %v1125_v31  }
 0x478   : > { %1138 = vperm.xlu2 %2789, %v1124_v32   ;;  %1148 = vperm.xlu0 %2790, %v1126_v34  }
 0x480   : > { %1133 = vperm.xlu0 %2790, %v1123_v35  }
 0x4b2   : > { %v2844_v43 = vpop.permute.xlu2 %2843 }
 0x4b3   : > { %v2845_v45 = vunpack.i.l.bf16 %v2844_v43  ;;  %v2846_v47 = vunpack.i.h.bf16 %v2844_v43 }
 0x4ba   : > { %v2859_v52 = vpop.permute.xlu2 %2858 }
 0x4bb   : > { %v2860_v54 = vunpack.i.l.bf16 %v2859_v52  ;;  %v2861_v55 = vunpack.i.h.bf16 %v2859_v52 }
 0x4c2   : > { %v2839_v40 = vpop.permute.xlu1 %2838 }
 0x4c3   : > { %v2840_v42 = vunpack.i.l.bf16 %v2839_v40  ;;  %v2841_v44 = vunpack.i.h.bf16 %v2839_v40 }
 0x4ca   : > { %v2834_v36 = vpop.permute.xlu0 %2833 }
 0x4cb   : > { %v2835_v39 = vunpack.i.l.bf16 %v2834_v36  ;;  %v2836_v41 = vunpack.i.h.bf16 %v2834_v36  ;;  %v2854_v49 = vpop.permute.xlu1 %2853 }
 0x4cc   : > { %v2855_v51 = vunpack.i.l.bf16 %v2854_v49  ;;  %v2856_v53 = vunpack.i.h.bf16 %v2854_v49 }
 0x4cd   : > { %1195 = vmatpush.msrb.mxu2 %v2835_v39  ;;  %2703 = vmatpush.msrb.mxu3 %v2835_v39 }
 0x4cf   : > { %1196 = vmatpush.msrb.mxu2 %v2836_v41  ;;  %2704 = vmatpush.msrb.mxu3 %v2836_v41 }
 0x4d1   : > { %1197 = vmatpush.msrb.mxu2 %v2840_v42  ;;  %2705 = vmatpush.msrb.mxu3 %v2840_v42 }
 0x4d2   : > { %v2849_v46 = vpop.permute.xlu0 %2848 }
 0x4d3   : > { %1198 = vmatpush.msrb.mxu2 %v2841_v44  ;;  %2706 = vmatpush.msrb.mxu3 %v2841_v44  ;;  %v2850_v48 = vunpack.i.l.bf16 %v2849_v46  ;;  %v2851_v50 = vunpack.i.h.bf16 %v2849_v46  ;;  %v2869_v60 = vpop.permute.xlu1 %2868 }
 0x4d4   : > { %v2870_v62 = vunpack.i.l.bf16 %v2869_v60  ;;  %v2871_v63 = vunpack.i.h.bf16 %v2869_v60 }
 0x4d5   : > { %1199 = vmatpush.msrb.mxu2 %v2845_v45  ;;  %2707 = vmatpush.msrb.mxu3 %v2845_v45 }
 0x4d7   : > { %1200 = vmatpush.msrb.mxu2 %v2846_v47  ;;  %2708 = vmatpush.msrb.mxu3 %v2846_v47 }
 0x4d9   : > { %1201 = vmatpush.msrb.mxu2 %v2850_v48  ;;  %2709 = vmatpush.msrb.mxu3 %v2850_v48 }
 0x4da   : > { %v2864_v56 = vpop.permute.xlu0 %2863 }
 0x4db   : > { %1202 = vmatpush.msrb.mxu2 %v2851_v50  ;;  %2710 = vmatpush.msrb.mxu3 %v2851_v50  ;;  %v2865_v59 = vunpack.i.l.bf16 %v2864_v56  ;;  %v2866_v61 = vunpack.i.h.bf16 %v2864_v56  ;;  %v1159_v40 = vpop.permute.xlu1 %1158 }
 0x4dd   : > { %1203 = vmatpush.msrb.mxu2 %v2855_v51  ;;  %2711 = vmatpush.msrb.mxu3 %v2855_v51 }
 0x4df   : > { %1204 = vmatpush.msrb.mxu2 %v2856_v53  ;;  %2712 = vmatpush.msrb.mxu3 %v2856_v53 }
 0x4e1   : > { %1205 = vmatpush.msrb.mxu2 %v2860_v54  ;;  %2713 = vmatpush.msrb.mxu3 %v2860_v54 }
 0x4e3   : > { %1206 = vmatpush.msrb.mxu2 %v2861_v55  ;;  %2714 = vmatpush.msrb.mxu3 %v2861_v55  ;;  %v1144_v46 = vpop.permute.xlu1 %1143 }
 0x4e5   : > { %2620 = vmatpush.msk.msrb.mxu2 %vm683_vm7, %v3533_v19  ;;  %2715 = vmatpush.msk.msrb.mxu3 %vm683_vm7, %v3533_v19 }
 0x4e7   : > { %2621 = vmatpush.msk.msrb.mxu2 %vm683_vm7, %v3536_v21  ;;  %2716 = vmatpush.msk.msrb.mxu3 %vm683_vm7, %v3536_v21 }
 0x4e9   : > { %2622 = vmatpush.msk.msrb.mxu2 %vm683_vm7, %v3522_v14  ;;  %2717 = vmatpush.msk.msrb.mxu3 %vm683_vm7, %v3522_v14  ;;  %v1164_v14 = vpop.permute.xlu0 %1163 }
 0x4eb   : > { %2623 = vmatpush.msk.msrb.mxu2 %vm683_vm7, %v3525_v15  ;;  %2718 = vmatpush.msk.msrb.mxu3 %vm683_vm7, %v3525_v15  ;;  %v1169_v15 = vpop.permute.xlu2 %1168  ;;  %vm1510_vm7 = vcmask 523264  }
 0x4ec   : > { %1211 = vmatmul.f32.vlgmr.msrb.gmra.mxu2 %v1107_v57  ;;  %1232 = vmatmul.f32.vlgmr.msrb.gmra.mxu3 %v1121_v58 }
 0x4ed   : > { %1248 = vmatpush.msra.mxu3 %v2865_v59 }
 0x4ef   : > { %1249 = vmatpush.msra.mxu3 %v2866_v61 }
 0x4f1   : > { %1250 = vmatpush.msra.mxu3 %v2870_v62  ;;  %v1149_v16 = vpop.permute.xlu0 %1148 }
 0x4f3   : > { %1251 = vmatpush.msra.mxu3 %v2871_v63  ;;  %v1154_v19 = vpop.permute.xlu2 %1153 }
 0x4f4   : > { %1214 = vmatmul.f32.gmra.mxu2 %v1109_v0  ;;  %2624 = vmatmul.msk.f32.vlgmr.msra.gmra.mxu3 %vm842_vm9, %v1108_v1 }
 0x4f9   : > { %v1134_v20 = vpop.permute.xlu0 %1133 }
 0x4fb   : > { %v1139_v25 = vpop.permute.xlu2 %1138 }
 0x4fc   : > { %1217 = vmatmul.f32.gmra.mxu2 %v1111_v2  ;;  %2625 = vmatmul.msk.f32.gmra.mxu3 %vm842_vm9, %v1110_v3 }
 0x504   : > { %1220 = vmatmul.f32.gmra.mxu2 %v1113_v4  ;;  %2626 = vmatmul.msk.f32.gmra.mxu3 %vm842_vm9, %v1112_v5 }
 0x50c   : > { %1223 = vmatmul.f32.gmra.mxu2 %v1115_v6  ;;  %2627 = vmatmul.msk.f32.gmra.mxu3 %vm842_vm9, %v1114_v7 }
 0x514   : > { %1226 = vmatmul.f32.gmra.mxu2 %v1117_v8  ;;  %2628 = vmatmul.msk.f32.gmra.mxu3 %vm842_vm9, %v1116_v9 }
 0x51c   : > { %1229 = vmatmul.f32.gmra.mxu2 %v1119_v10  ;;  %2629 = vmatmul.msk.f32.gmra.mxu3 %vm842_vm9, %v1118_v11 }
 0x524   : > { %2630 = vmatmul.msk.f32.gmra.mxu3 %vm842_vm9, %v1120_v12 }
 0x52c   : > { %2631 = vmatmul.msk.f32.gmra.mxu3 %vm842_vm9, %v1122_v13 }
 0x56f   : > { %v1212_v17 = vpop.f32.mrf.mxu2  ;;  %v1233_v18 = vpop.f32.mrf.mxu3 }
 0x570   : > { %v1213_v21 = vadd.f32 %v1212_v17, %v1134_v20  ;;  %v1234_v56 = vadd.f32 %v1233_v18, %v1169_v15 }
 0x577   : > { %v1215_v22 = vpop.f32.mrf.mxu2  ;;  %v1253_v23 = vpop.f32.mrf.mxu3 }
 0x578   : > { %v1254_v24 = vadd.f32 %v1253_v23, %v1213_v21  ;;  %v1216_v26 = vadd.f32 %v1215_v22, %v1139_v25 }
 0x57a   : > { %v1277_v0 = vmax.f32 %v1254_v24, 0.0 }
 0x57f   : > { %v1218_v27 = vpop.f32.mrf.mxu2  ;;  %v1256_v30 = vpop.f32.mrf.mxu3 }
 0x580   : > { %v1257_v31 = vadd.f32 %v1256_v30, %v1216_v26  ;;  %v1219_v48 = vadd.f32 %v1218_v27, %v1144_v46 }
 0x582   : > { %v1278_v2 = vmax.f32 %v1257_v31, 0.0 }
 0x587   : > { %v1221_v32 = vpop.f32.mrf.mxu2  ;;  %v1259_v34 = vpop.f32.mrf.mxu3 }
 0x588   : > { %v1260_v49 = vadd.f32 %v1259_v34, %v1219_v48  ;;  %v1222_v55 = vadd.f32 %v1221_v32, %v1149_v16  ;;  %v1468_v34 = vld [vmem:[%s4131_s8 + $0x30] sm:$0xff] }
 0x58a   : > { %v1279_v53 = vmax.f32 %v1260_v49, 0.0 }
 0x58f   : > { %v1224_v35 = vpop.f32.mrf.mxu2  ;;  %v1262_v36 = vpop.f32.mrf.mxu3 }
 0x590   : > { %v1263_v57 = vadd.f32 %v1262_v36, %v1222_v55  ;;  %v1225_v62 = vadd.f32 %v1224_v35, %v1154_v19  ;;  %v1465_v35 = vld [vmem:[%s4131_s8 + $0x18] sm:$0xff] }
 0x591   : > { %v1469_v36 = vld [vmem:[%s4131_s8 + $0x38] sm:$0xff] }
 0x592   : > { %v1280_v60 = vmax.f32 %v1263_v57, 0.0 }
 0x597   : > { %v1265_v39 = vpop.f32.mrf.mxu3  ;;  %v1227_v41 = vpop.f32.mrf.mxu2 }
 0x598   : > { %v1228_v42 = vadd.f32 %v1227_v41, %v1159_v40  ;;  %v1266_v63 = vadd.f32 %v1265_v39, %v1225_v62  ;;  %v1462_v39 = vld [vmem:[%s4131_s8] sm:$0xff]  ;;  %v1467_v41 = vld [vmem:[%s4131_s8 + $0x28] sm:$0xff] }
 0x599   : > { %v1466_v40 = vld [vmem:[%s4131_s8 + $0x20] sm:$0xff] }
 0x59a   : > { %v1281_v1 = vmax.f32 %v1266_v63, 0.0 }
 0x59f   : > { %v1268_v43 = vpop.f32.mrf.mxu3  ;;  %v1230_v47 = vpop.f32.mrf.mxu2 }
 0x5a0   : > { %v1269_v44 = vadd.f32 %v1268_v43, %v1228_v42  ;;  %v1231_v50 = vadd.f32 %v1230_v47, %v1164_v14  ;;  %v1463_v42 = vld [vmem:[%s4131_s8 + $0x8] sm:$0xff]  ;;  %v1464_v43 = vld [vmem:[%s4131_s8 + $0x10] sm:$0xff] }
 0x5a2   : > { %v1282_v45 = vmax.f32 %v1269_v44, 0.0 }
 0x5a4   : > { %1303 = vrot.lane.b32.xlu0 %v1282_v45, %s3207_s30 }
 0x5a7   : > { %v1271_v51 = vpop.f32.mrf.mxu3 }
 0x5a8   : > { %v1272_v52 = vadd.f32 %v1271_v51, %v1231_v50 }
 0x5aa   : > { %v1283_v54 = vmax.f32 %v1272_v52, 0.0 }
 0x5ac   : > { %1305 = vrot.lane.b32.xlu2 %v1283_v54, %s3207_s30  ;;  %1297 = vrot.lane.b32.xlu0 %v1279_v53, %s3207_s30 }
 0x5af   : > { %v1274_v58 = vpop.f32.mrf.mxu3 }
 0x5b0   : > { %v1275_v59 = vadd.f32 %v1274_v58, %v1234_v56 }
 0x5b2   : > { %v1284_v61 = vmax.f32 %v1275_v59, 0.0 }
 0x5b4   : > { %1307 = vrot.lane.b32.xlu1 %v1284_v61, %s3207_s30  ;;  %1299 = vrot.lane.b32.xlu2 %v1280_v60, %s3207_s30 }
 0x5bc   : > { %1301 = vrot.lane.b32.xlu1 %v1281_v1, %s3207_s30  ;;  %1293 = vrot.lane.b32.xlu2 %v1277_v0, %s3207_s30 }
 0x5c4   : > { %1295 = vrot.lane.b32.xlu1 %v1278_v2, %s3207_s30 }
 0x606   : > { %v1306_v3 = vpop.permute.xlu2 %1305 }
 0x607   : > { %v3665_v12 = vsel %vm626_vm0, 0.0, %v1306_v3 }
 0x608   : > { %v1332_v15 = vsel %vm1325_vm6, %v3665_v12, 0.0 }
 0x60e   : > { %v1300_v5 = vpop.permute.xlu2 %1299 }
 0x60f   : > { %v3654_v6 = vsel %vm626_vm0, 0.0, %v1300_v5 }
 0x610   : > { %v1329_v9 = vsel %vm1325_vm6, %v3654_v6, 0.0 }
 0x616   : > { %v1304_v4 = vpop.permute.xlu0 %1303  ;;  %v1294_v24 = vpop.permute.xlu2 %1293 }
 0x617   : > { %v3676_v18 = vsel %vm626_vm0, 0.0, %v1304_v4  ;;  %v3688_v25 = vsel %vm626_vm0, 0.0, %v1294_v24 }
 0x618   : > { %v1331_v21 = vsel %vm1325_vm6, %v3676_v18, 0.0  ;;  %v1326_v30 = vsel %vm1325_vm6, %v3688_v25, 0.0 }
 0x61e   : > { %v1298_v7 = vpop.permute.xlu0 %1297 }
 0x61f   : > { %v3657_v8 = vsel %vm626_vm0, 0.0, %v1298_v7 }
 0x620   : > { %v1328_v10 = vsel %vm1325_vm6, %v3657_v8, 0.0 }
 0x621   : > { %v2882_v11 = vpack.i.bf16 %v1328_v10, %v1329_v9 }
 0x623   : > { %2883 = vrot.lane.b32.xlu2 %v2882_v11, %s3210_s2 }
 0x626   : > { %v1308_v13 = vpop.permute.xlu1 %1307 }
 0x627   : > { %v3668_v14 = vsel %vm626_vm0, 0.0, %v1308_v13 }
 0x628   : > { %v1333_v16 = vsel %vm1325_vm6, %v3668_v14, 0.0 }
 0x629   : > { %v2872_v17 = vpack.i.bf16 %v1332_v15, %v1333_v16 }
 0x62b   : > { %2873 = vrot.lane.b32.xlu0 %v2872_v17, %s3210_s2 }
 0x62e   : > { %v1302_v19 = vpop.permute.xlu1 %1301 }
 0x62f   : > { %v3679_v20 = vsel %vm626_vm0, 0.0, %v1302_v19 }
 0x630   : > { %v1330_v22 = vsel %vm1325_vm6, %v3679_v20, 0.0 }
 0x631   : > { %v2877_v23 = vpack.i.bf16 %v1330_v22, %v1331_v21  ;;  %v1441_v22 = vld [vmem:[#allocation2 + $0x18] sm:$0xff] }
 0x633   : > { %2878 = vrot.lane.b32.xlu1 %v2877_v23, %s3210_s2  ;;  %2893 = vrot.lane.b32.xlu2 %v2877_v23, %s3208_s19 }
 0x636   : > { %v1296_v26 = vpop.permute.xlu1 %1295 }
 0x637   : > { %v3691_v27 = vsel %vm626_vm0, 0.0, %v1296_v26 }
 0x638   : > { %v1327_v31 = vsel %vm1325_vm6, %v3691_v27, 0.0 }
 0x639   : > { %v2887_v32 = vpack.i.bf16 %v1326_v30, %v1327_v31 }
 0x63b   : > { %2903 = vrot.lane.b32.xlu1 %v2872_v17, %s3208_s19  ;;  %2918 = vrot.lane.b32.xlu2 %v2872_v17, %s3211_s23 }
 0x63c   : > { %2888 = vrot.lane.b32.xlu0 %v2887_v32, %s3210_s2 }
 0x643   : > { %2923 = vrot.lane.b32.xlu2 %v2877_v23, %s3209_s20  ;;  %2908 = vrot.lane.b32.xlu1 %v2887_v32, %s3208_s19 }
 0x644   : > { %2898 = vrot.lane.b32.xlu0 %v2882_v11, %s3208_s19 }
 0x64b   : > { %2943 = vrot.lane.b32.xlu2 %v2887_v32, %s3211_s23  ;;  %2913 = vrot.lane.b32.xlu1 %v2877_v23, %s3211_s23  ;;  %v1459_v23 = vld [vmem:[#allocation2 + $0xa8] sm:$0xff] }
 0x64c   : > { %2928 = vrot.lane.b32.xlu0 %v2872_v17, %s3209_s20 }
 0x653   : > { %1502 = vperm.xlu2 %2789, %v1468_v34   ;;  %2938 = vrot.lane.b32.xlu1 %v2882_v11, %s3209_s20  ;;  %v1439_v34 = vld [vmem:[#allocation2 + $0x8] sm:$0xff] }
 0x654   : > { %2933 = vrot.lane.b32.xlu0 %v2882_v11, %s3211_s23 }
 0x65b   : > { %1487 = vperm.xlu2 %2789, %v1465_v35   ;;  %1507 = vperm.xlu1 %2791, %v1469_v36   ;;  %v1444_v36 = vld [vmem:[#allocation2 + $0x30] sm:$0xff] }
 0x65c   : > { %2948 = vrot.lane.b32.xlu0 %v2887_v32, %s3209_s20 }
 0x663   : > { %1472 = vperm.xlu2 %2789, %v1462_v39   ;;  %1492 = vperm.xlu1 %2791, %v1466_v40   ;;  %v1440_v39 = vld [vmem:[#allocation2 + $0x10] sm:$0xff]  ;;  %v1442_v40 = vld [vmem:[#allocation2 + $0x20] sm:$0xff] }
 0x664   : > { %1497 = vperm.xlu0 %2790, %v1467_v41   ;;  %v1447_v41 = vld [vmem:[#allocation2 + $0x48] sm:$0xff] }
 0x66b   : > { %1477 = vperm.xlu1 %2791, %v1463_v42   ;;  %v1443_v42 = vld [vmem:[#allocation2 + $0x28] sm:$0xff] }
 0x66c   : > { %1482 = vperm.xlu0 %2790, %v1464_v43   ;;  %v1445_v43 = vld [vmem:[#allocation2 + $0x38] sm:$0xff] }
 0x67d   : > { %v2884_v47 = vpop.permute.xlu2 %2883 }
 0x67e   : > { %v2885_v51 = vunpack.i.l.bf16 %v2884_v47  ;;  %v2886_v52 = vunpack.i.h.bf16 %v2884_v47  ;;  %v1453_v47 = vld [vmem:[#allocation2 + $0x78] sm:$0xff] }
 0x68d   : > { %v2894_v53 = vpop.permute.xlu2 %2893 }
 0x68e   : > { %v2895_v60 = vunpack.i.l.bf16 %v2894_v53  ;;  %v2896_v61 = vunpack.i.h.bf16 %v2894_v53  ;;  %v1457_v53 = vld [vmem:[#allocation2 + $0x98] sm:$0xff] }
 0x695   : > { %v2919_v0 = vpop.permute.xlu2 %2918 }
 0x696   : > { %v2920_v13 = vunpack.i.l.bf16 %v2919_v0  ;;  %v2921_v15 = vunpack.i.h.bf16 %v2919_v0 }
 0x69d   : > { %v2874_v44 = vpop.permute.xlu0 %2873  ;;  %v2924_v10 = vpop.permute.xlu2 %2923 }
 0x69e   : > { %v2875_v45 = vunpack.i.l.bf16 %v2874_v44  ;;  %v2876_v46 = vunpack.i.h.bf16 %v2874_v44  ;;  %v2926_v16 = vunpack.i.h.bf16 %v2924_v10  ;;  %v1450_v44 = vld [vmem:[#allocation2 + $0x60] sm:$0xff] }
 0x6a0   : > { %1535 = vmatpush.msrb.mxu1 %v2875_v45  ;;  %2719 = vmatpush.msra.mxu2 %v2875_v45  ;;  %v1446_v45 = vld [vmem:[#allocation2 + $0x40] sm:$0xff] }
 0x6a2   : > { %1536 = vmatpush.msrb.mxu1 %v2876_v46  ;;  %2720 = vmatpush.msra.mxu2 %v2876_v46  ;;  %v1448_v46 = vld [vmem:[#allocation2 + $0x50] sm:$0xff] }
 0x6a5   : > { %v2879_v48 = vpop.permute.xlu1 %2878 }
 0x6a6   : > { %v2880_v49 = vunpack.i.l.bf16 %v2879_v48  ;;  %v2881_v50 = vunpack.i.h.bf16 %v2879_v48  ;;  %v1449_v48 = vld [vmem:[#allocation2 + $0x58] sm:$0xff] }
 0x6a8   : > { %1537 = vmatpush.msrb.mxu1 %v2880_v49  ;;  %2721 = vmatpush.msra.mxu2 %v2880_v49  ;;  %v1451_v49 = vld [vmem:[#allocation2 + $0x68] sm:$0xff] }
 0x6aa   : > { %1538 = vmatpush.msrb.mxu1 %v2881_v50  ;;  %2722 = vmatpush.msra.mxu2 %v2881_v50  ;;  %v1452_v50 = vld [vmem:[#allocation2 + $0x70] sm:$0xff] }
 0x6ac   : > { %1539 = vmatpush.msrb.mxu1 %v2885_v51  ;;  %2723 = vmatpush.msra.mxu2 %v2885_v51  ;;  %v1454_v51 = vld [vmem:[#allocation2 + $0x80] sm:$0xff] }
 0x6ad   : > { %v2904_v54 = vpop.permute.xlu1 %2903 }
 0x6ae   : > { %v2905_v55 = vunpack.i.l.bf16 %v2904_v54  ;;  %v2889_v56 = vpop.permute.xlu0 %2888  ;;  %1540 = vmatpush.msrb.mxu1 %v2886_v52  ;;  %2724 = vmatpush.msra.mxu2 %v2886_v52  ;;  %v2906_v58 = vunpack.i.h.bf16 %v2904_v54  ;;  %v1455_v52 = vld [vmem:[#allocation2 + $0x88] sm:$0xff]  ;;  %v1458_v54 = vld [vmem:[#allocation2 + $0xa0] sm:$0xff] }
 0x6af   : > { %v2890_v57 = vunpack.i.l.bf16 %v2889_v56  ;;  %v2891_v59 = vunpack.i.h.bf16 %v2889_v56  ;;  %v1461_v56 = vld [vmem:[#allocation2 + $0xb8] sm:$0xff] }
 0x6b0   : > { %1576 = vmatpush.msra.mxu0 %v2905_v55  ;;  %v1460_v55 = vld [vmem:[#allocation2 + $0xb0] sm:$0xff] }
 0x6b1   : > { %1541 = vmatpush.msrb.mxu1 %v2890_v57  ;;  %2725 = vmatpush.msra.mxu2 %v2890_v57 }
 0x6b2   : > { %1577 = vmatpush.msra.mxu0 %v2906_v58 }
 0x6b3   : > { %1542 = vmatpush.msrb.mxu1 %v2891_v59  ;;  %2726 = vmatpush.msra.mxu2 %v2891_v59 }
 0x6b4   : > { %1578 = vmatpush.msra.mxu0 %v2895_v60 }
 0x6b5   : > { %2632 = vmatpush.msk.msrb.mxu1 %vm1325_vm6, %v3668_v14  ;;  %2727 = vmatpush.msk.msra.mxu2 %vm1325_vm6, %v3668_v14  ;;  %v2909_v62 = vpop.permute.xlu1 %2908 }
 0x6b6   : > { %v2899_v63 = vpop.permute.xlu0 %2898  ;;  %1579 = vmatpush.msra.mxu0 %v2896_v61  ;;  %v2910_v3 = vunpack.i.l.bf16 %v2909_v62  ;;  %v2911_v5 = vunpack.i.h.bf16 %v2909_v62 }
 0x6b7   : > { %v2900_v1 = vunpack.i.l.bf16 %v2899_v63  ;;  %2633 = vmatpush.msk.msrb.mxu1 %vm1325_vm6, %v3665_v12  ;;  %2728 = vmatpush.msk.msra.mxu2 %vm1325_vm6, %v3665_v12  ;;  %v2901_v2 = vunpack.i.h.bf16 %v2899_v63  ;;  %v1456_v12 = vld [vmem:[#allocation2 + $0x90] sm:$0xff] }
 0x6b9   : > { %2634 = vmatpush.msk.msrb.mxu1 %vm1325_vm6, %v3676_v18  ;;  %2729 = vmatpush.msk.msra.mxu2 %vm1325_vm6, %v3676_v18 }
 0x6ba   : > { %1580 = vmatpush.msra.mxu0 %v2900_v1 }
 0x6bb   : > { %2635 = vmatpush.msk.msrb.mxu1 %vm1325_vm6, %v3679_v20  ;;  %2730 = vmatpush.msk.msra.mxu2 %vm1325_vm6, %v3679_v20 }
 0x6bc   : > { %1581 = vmatpush.msra.mxu0 %v2901_v2 }
 0x6bd   : > { %2636 = vmatpush.msk.msrb.mxu1 %vm1325_vm6, %v3654_v6  ;;  %2731 = vmatpush.msk.msra.mxu2 %vm1325_vm6, %v3654_v6  ;;  %v2914_v4 = vpop.permute.xlu1 %2913  ;;  %v1438_v6 = vld [vmem:[#allocation2] sm:$0xff] }
 0x6be   : > { %1582 = vmatpush.msra.mxu0 %v2910_v3  ;;  %v2929_v7 = vpop.permute.xlu0 %2928  ;;  %v2915_v19 = vunpack.i.l.bf16 %v2914_v4  ;;  %v2916_v20 = vunpack.i.h.bf16 %v2914_v4 }
 0x6bf   : > { %v2930_v9 = vunpack.i.l.bf16 %v2929_v7  ;;  %2637 = vmatpush.msk.msrb.mxu1 %vm1325_vm6, %v3657_v8  ;;  %2732 = vmatpush.msk.msra.mxu2 %vm1325_vm6, %v3657_v8  ;;  %v2931_v11 = vunpack.i.h.bf16 %v2929_v7  ;;  %v2925_v8 = vunpack.i.l.bf16 %v2924_v10 }
 0x6c0   : > { %1583 = vmatpush.msra.mxu0 %v2911_v5 }
 0x6c1   : > { %2638 = vmatpush.msk.msrb.mxu1 %vm1325_vm6, %v3691_v27  ;;  %2733 = vmatpush.msk.msra.mxu2 %vm1325_vm6, %v3691_v27 }
 0x6c2   : > { %1584 = vmatpush.msra.mxu0 %v2930_v9 }
 0x6c3   : > { %2639 = vmatpush.msk.msrb.mxu1 %vm1325_vm6, %v3688_v25  ;;  %2734 = vmatpush.msk.msra.mxu2 %vm1325_vm6, %v3688_v25  ;;  %v2944_v25 = vpop.permute.xlu2 %2943 }
 0x6c4   : > { %1585 = vmatpush.msra.mxu0 %v2931_v11  ;;  %1551 = vmatmul.f32.vlgmr.msrb.gmra.mxu1 %v1438_v6  ;;  %v2945_v31 = vunpack.i.l.bf16 %v2944_v25  ;;  %v2946_v35 = vunpack.i.h.bf16 %v2944_v25 }
 0x6c5   : > { %1569 = vmatmul.f32.vlgmr.msra.gmra.mxu2 %v1456_v12  ;;  %v2939_v14 = vpop.permute.xlu1 %2938 }
 0x6c6   : > { %1625 = vmatpush.msrb.mxu2 %v2920_v13  ;;  %1586 = vmatpush.msra.mxu0 %v2925_v8  ;;  %v2940_v17 = vunpack.i.l.bf16 %v2939_v14  ;;  %v2934_v18 = vpop.permute.xlu0 %2933  ;;  %v2941_v21 = vunpack.i.h.bf16 %v2939_v14 }
 0x6c7   : > { %v2935_v24 = vunpack.i.l.bf16 %v2934_v18  ;;  %v2936_v26 = vunpack.i.h.bf16 %v2934_v18 }
 0x6c8   : > { %1626 = vmatpush.msrb.mxu2 %v2921_v15  ;;  %1587 = vmatpush.msra.mxu0 %v2926_v16 }
 0x6ca   : > { %1627 = vmatpush.msrb.mxu2 %v2915_v19  ;;  %1588 = vmatpush.msra.mxu0 %v2940_v17 }
 0x6cb   : > { %v1503_v57 = vpop.permute.xlu2 %1502 }
 0x6cc   : > { %1628 = vmatpush.msrb.mxu2 %v2916_v20  ;;  %1589 = vmatpush.msra.mxu0 %v2941_v21 }
 0x6cd   : > { %1554 = vmatmul.f32.gmra.mxu1 %v1441_v22  ;;  %1572 = vmatmul.f32.gmra.mxu2 %v1459_v23  ;;  %v1508_v17 = vpop.permute.xlu1 %1507 }
 0x6ce   : > { %1629 = vmatpush.msrb.mxu2 %v2935_v24  ;;  %v2949_v27 = vpop.permute.xlu0 %2948 }
 0x6cf   : > { %v2950_v30 = vunpack.i.l.bf16 %v2949_v27  ;;  %v2951_v32 = vunpack.i.h.bf16 %v2949_v27 }
 0x6d0   : > { %1630 = vmatpush.msrb.mxu2 %v2936_v26 }
 0x6d1   : > { %1590 = vmatpush.msra.mxu0 %v2950_v30 }
 0x6d2   : > { %1631 = vmatpush.msrb.mxu2 %v2945_v31 }
 0x6d3   : > { %1591 = vmatpush.msra.mxu0 %v2951_v32  ;;  %v1488_v58 = vpop.permute.xlu2 %1487 }
 0x6d4   : > { %1632 = vmatpush.msrb.mxu2 %v2946_v35  ;;  %1592 = vmatmul.f32.vlgmr.msra.gmra.mxu0 %v1439_v34 }
 0x6d5   : > { %1557 = vmatmul.f32.gmra.mxu1 %v1444_v36  ;;  %2640 = vmatmul.msk.f32.vlgmr.msrb.gmra.mxu2 %vm1510_vm7, %v1440_v39  ;;  %v1493_v26 = vpop.permute.xlu1 %1492 }
 0x6d6   : > { %v1498_v7 = vpop.permute.xlu0 %1497 }
 0x6db   : > { %v1473_v61 = vpop.permute.xlu2 %1472 }
 0x6dc   : > { %1595 = vmatmul.f32.gmra.mxu0 %v1442_v40 }
 0x6dd   : > { %1560 = vmatmul.f32.gmra.mxu1 %v1447_v41  ;;  %2641 = vmatmul.msk.f32.gmra.mxu2 %vm1510_vm7, %v1443_v42 }
 0x6de   : > { %v1483_v11 = vpop.permute.xlu0 %1482 }
 0x6e4   : > { %1598 = vmatmul.f32.gmra.mxu0 %v1445_v43 }
 0x6e5   : > { %1563 = vmatmul.f32.gmra.mxu1 %v1450_v44  ;;  %2642 = vmatmul.msk.f32.gmra.mxu2 %vm1510_vm7, %v1446_v45 }
 0x6ec   : > { %1601 = vmatmul.f32.gmra.mxu0 %v1448_v46 }
 0x6ed   : > { %1566 = vmatmul.f32.gmra.mxu1 %v1453_v47  ;;  %2643 = vmatmul.msk.f32.gmra.mxu2 %vm1510_vm7, %v1449_v48 }
 0x6f4   : > { %1604 = vmatmul.f32.gmra.mxu0 %v1451_v49 }
 0x6f5   : > { %2644 = vmatmul.msk.f32.gmra.mxu2 %vm1510_vm7, %v1452_v50 }
 0x6fc   : > { %1607 = vmatmul.f32.gmra.mxu0 %v1454_v51 }
 0x6fd   : > { %2645 = vmatmul.msk.f32.gmra.mxu2 %vm1510_vm7, %v1455_v52 }
 0x704   : > { %1610 = vmatmul.f32.gmra.mxu0 %v1457_v53 }
 0x705   : > { %2646 = vmatmul.msk.f32.gmra.mxu2 %vm1510_vm7, %v1458_v54 }
 0x70c   : > { %1613 = vmatmul.f32.gmra.mxu0 %v1460_v55  ;;  %v1478_v55 = vpop.permute.xlu1 %1477 }
 0x70d   : > { %2647 = vmatmul.msk.f32.gmra.mxu2 %vm1510_vm7, %v1461_v56 }
 0x741   : > { %v1552_v59 = vpop.f32.mrf.mxu1 }
 0x742   : > { %v1553_v62 = vadd.f32 %v1552_v59, %v1473_v61 }
 0x748   : > { %v1570_v60 = vpop.f32.mrf.mxu2 }
 0x749   : > { %v1571_v45 = vadd.f32 %v1570_v60, %v1503_v57 }
 0x74a   : > { %v1555_v1 = vpop.f32.mrf.mxu1 }
 0x74b   : > { %v1556_v56 = vadd.f32 %v1555_v1, %v1478_v55 }
 0x750   : > { %v1573_v63 = vpop.f32.mrf.mxu2 }
 0x751   : > { %v1593_v0 = vpop.f32.mrf.mxu0  ;;  %v1574_v51 = vadd.f32 %v1573_v63, %v1508_v17 }
 0x752   : > { %v1594_v2 = vadd.f32 %v1593_v0, %v1553_v62  ;;  %v1558_v9 = vpop.f32.mrf.mxu1 }
 0x753   : > { %v1559_v12 = vadd.f32 %v1558_v9, %v1483_v11 }
 0x758   : > { %v1634_v3 = vpop.f32.mrf.mxu2 }
 0x759   : > { %v3773_v4 = vadd.f32 %v1634_v3, %v1594_v2  ;;  %v1596_v5 = vpop.f32.mrf.mxu0 }
 0x75a   : > { %v1561_v13 = vpop.f32.mrf.mxu1 }
 0x75b   : > { %v1562_v19 = vadd.f32 %v1561_v13, %v1488_v58  ;;  %v1597_v58 = vadd.f32 %v1596_v5, %v1556_v56  ;;  %v1658_v61 = vmax.f32 %v3773_v4, 0.0 }
 0x760   : > { %v1637_v10 = vpop.f32.mrf.mxu2 }
 0x761   : > { %v1599_v6 = vpop.f32.mrf.mxu0  ;;  %v1638_v59 = vadd.f32 %v1637_v10, %v1597_v58 }
 0x762   : > { %v1600_v8 = vadd.f32 %v1599_v6, %v1559_v12  ;;  %v1564_v21 = vpop.f32.mrf.mxu1 }
 0x763   : > { %v1565_v27 = vadd.f32 %v1564_v21, %v1493_v26  ;;  %v1659_v60 = vmax.f32 %v1638_v59, 0.0 }
 0x768   : > { %v1640_v14 = vpop.f32.mrf.mxu2 }
 0x769   : > { %v1641_v15 = vadd.f32 %v1640_v14, %v1600_v8  ;;  %v1602_v16 = vpop.f32.mrf.mxu0 }
 0x76a   : > { %v1603_v20 = vadd.f32 %v1602_v16, %v1562_v19  ;;  %v1567_v35 = vpop.f32.mrf.mxu1 }
 0x76b   : > { %v1660_v18 = vmax.f32 %v1641_v15, 0.0  ;;  %v1568_v39 = vadd.f32 %v1567_v35, %v1498_v7 }
 0x76d   : > { %1678 = vrot.lane.b32.xlu0 %v1660_v18, %s3215_s1 }
 0x770   : > { %v1643_v22 = vpop.f32.mrf.mxu2 }
 0x771   : > { %v1644_v23 = vadd.f32 %v1643_v22, %v1603_v20  ;;  %v1605_v24 = vpop.f32.mrf.mxu0 }
 0x772   : > { %v1606_v30 = vadd.f32 %v1605_v24, %v1565_v27 }
 0x773   : > { %v1661_v25 = vmax.f32 %v1644_v23, 0.0 }
 0x775   : > { %1680 = vrot.lane.b32.xlu1 %v1661_v25, %s3215_s1 }
 0x778   : > { %v1646_v31 = vpop.f32.mrf.mxu2 }
 0x779   : > { %v1647_v32 = vadd.f32 %v1646_v31, %v1606_v30  ;;  %v1608_v34 = vpop.f32.mrf.mxu0 }
 0x77a   : > { %v1609_v40 = vadd.f32 %v1608_v34, %v1568_v39 }
 0x77b   : > { %v1662_v36 = vmax.f32 %v1647_v32, 0.0 }
 0x77d   : > { %1682 = vrot.lane.b32.xlu2 %v1662_v36, %s3215_s1 }
 0x780   : > { %v1649_v41 = vpop.f32.mrf.mxu2 }
 0x781   : > { %v1650_v42 = vadd.f32 %v1649_v41, %v1609_v40  ;;  %v1611_v43 = vpop.f32.mrf.mxu0 }
 0x782   : > { %v1612_v46 = vadd.f32 %v1611_v43, %v1571_v45 }
 0x783   : > { %v1663_v44 = vmax.f32 %v1650_v42, 0.0 }
 0x785   : > { %1858 = vrot.lane.b32.xlu2 %v1662_v36, %s3207_s30  ;;  %1684 = vrot.lane.b32.xlu0 %v1663_v44, %s3215_s1 }
 0x788   : > { %v1652_v47 = vpop.f32.mrf.mxu2 }
 0x789   : > { %v1653_v48 = vadd.f32 %v1652_v47, %v1612_v46  ;;  %v1614_v50 = vpop.f32.mrf.mxu0 }
 0x78a   : > { %v1615_v52 = vadd.f32 %v1614_v50, %v1574_v51 }
 0x78b   : > { %v1664_v49 = vmax.f32 %v1653_v48, 0.0 }
 0x78d   : > { %1686 = vrot.lane.b32.xlu1 %v1664_v49, %s3215_s1  ;;  %1860 = vrot.lane.b32.xlu0 %v1663_v44, %s3207_s30 }
 0x790   : > { %v1655_v53 = vpop.f32.mrf.mxu2 }
 0x791   : > { %v1656_v54 = vadd.f32 %v1655_v53, %v1615_v52 }
 0x793   : > { %v1665_v57 = vmax.f32 %v1656_v54, 0.0 }
 0x795   : > { %1864 = vrot.lane.b32.xlu2 %v1665_v57, %s3207_s30  ;;  %1862 = vrot.lane.b32.xlu1 %v1664_v49, %s3207_s30 }
 0x796   : > { %1688 = vrot.lane.b32.xlu0 %v1665_v57, %s3215_s1 }
 0x79d   : > { %1856 = vrot.lane.b32.xlu1 %v1661_v25, %s3207_s30  ;;  %1676 = vrot.lane.b32.xlu2 %v1659_v60, %s3215_s1 }
 0x79e   : > { %1854 = vrot.lane.b32.xlu0 %v1660_v18, %s3207_s30 }
 0x7a5   : > { %1852 = vrot.lane.b32.xlu2 %v1659_v60, %s3207_s30  ;;  %1674 = vrot.lane.b32.xlu1 %v1658_v61, %s3215_s1 }
 0x7a6   : > { %1850 = vrot.lane.b32.xlu0 %v1658_v61, %s3207_s30 }
 0x7d7   : > { %v1683_v62 = vpop.permute.xlu2 %1682 }
 0x7d8   : > { %v3815_v16 = vsel %vm1698_vm8, 0.0, %v1683_v62  ;;  %v2061_v62 = vld [vmem:[%s4134_s11 + $0x8] sm:$0xff] }
 0x7d9   : > { %v1712_v21 = vsel %vm1707_vm10, %v3815_v16, 0.0 }
 0x7df   : > { %v1859_v63 = vpop.permute.xlu2 %1858  ;;  %v1679_v0 = vpop.permute.xlu0 %1678 }
 0x7e0   : > { %v3803_v6 = vsel %vm626_vm0, 0.0, %v1859_v63  ;;  %v3806_v11 = vsel %vm1698_vm8, 0.0, %v1679_v0  ;;  %v2062_v63 = vld [vmem:[%s4134_s11 + $0x10] sm:$0xff]  ;;  %v2063_v0 = vld [vmem:[%s4134_s11 + $0x18] sm:$0xff] }
 0x7e1   : > { %v1887_v12 = vsel %vm1882_vm11, %v3803_v6, 0.0  ;;  %v1710_v13 = vsel %vm1707_vm10, %v3806_v11, 0.0 }
 0x7e2   : > { %v2972_v15 = vpack.i.bf16 %v1710_v13, %v1887_v12 }
 0x7e7   : > { %v1681_v3 = vpop.permute.xlu1 %1680 }
 0x7e8   : > { %v3843_v34 = vsel %vm1698_vm8, 0.0, %v1681_v3 }
 0x7e9   : > { %v1711_v43 = vsel %vm1707_vm10, %v3843_v34, 0.0 }
 0x7ea   : > { %v3002_v60 = vpack.i.bf16 %v1710_v13, %v1711_v43 }
 0x7ef   : > { %v1865_v1 = vpop.permute.xlu2 %1864 }
 0x7f0   : > { %v3793_v2 = vsel %vm626_vm0, 0.0, %v1865_v1  ;;  %v2060_v1 = vld [vmem:[%s4134_s11] sm:$0xff] }
 0x7f1   : > { %v1890_v7 = vsel %vm1882_vm11, %v3793_v2, 0.0 }
 0x7f7   : > { %v1685_v5 = vpop.permute.xlu0 %1684  ;;  %v1677_v24 = vpop.permute.xlu2 %1676 }
 0x7f8   : > { %v3796_v4 = vsel %vm1698_vm8, 0.0, %v1685_v5  ;;  %v3840_v32 = vsel %vm1698_vm8, 0.0, %v1677_v24 }
 0x7f9   : > { %v1713_v9 = vsel %vm1707_vm10, %v3796_v4, 0.0  ;;  %v1709_v41 = vsel %vm1707_vm10, %v3840_v32, 0.0 }
 0x7fa   : > { %v2967_v10 = vpack.i.bf16 %v1713_v9, %v1890_v7  ;;  %v2997_v61 = vpack.i.bf16 %v1712_v21, %v1713_v9 }
 0x7fc   : > { %2968 = vrot.lane.b32.xlu2 %v2967_v10, %s3210_s2 }
 0x7ff   : > { %v1687_v8 = vpop.permute.xlu1 %1686  ;;  %v1861_v14 = vpop.permute.xlu0 %1860 }
 0x800   : > { %v3818_v17 = vsel %vm1698_vm8, 0.0, %v1687_v8  ;;  %v3836_v31 = vsel %vm626_vm0, 0.0, %v1861_v14  ;;  %v1853_v46 = vpop.permute.xlu2 %1852 }
 0x801   : > { %v1714_v25 = vsel %vm1707_vm10, %v3818_v17, 0.0  ;;  %v1888_v36 = vsel %vm1882_vm11, %v3836_v31, 0.0  ;;  %v3862_v48 = vsel %vm626_vm0, 0.0, %v1853_v46 }
 0x802   : > { %v2962_v45 = vpack.i.bf16 %v1711_v43, %v1888_v36  ;;  %v1884_v55 = vsel %vm1882_vm11, %v3862_v48, 0.0 }
 0x804   : > { %2973 = vrot.lane.b32.xlu2 %v2972_v15, %s3210_s2 }
 0x807   : > { %v1863_v18 = vpop.permute.xlu1 %1862 }
 0x808   : > { %v3821_v19 = vsel %vm626_vm0, 0.0, %v1863_v18  ;;  %v1689_v20 = vpop.permute.xlu0 %1688 }
 0x809   : > { %v1889_v22 = vsel %vm1882_vm11, %v3821_v19, 0.0  ;;  %v3828_v23 = vsel %vm1698_vm8, 0.0, %v1689_v20 }
 0x80a   : > { %v2952_v26 = vpack.i.bf16 %v1712_v21, %v1889_v22  ;;  %v1715_v27 = vsel %vm1707_vm10, %v3828_v23, 0.0 }
 0x80b   : > { %v2957_v30 = vpack.i.bf16 %v1714_v25, %v1715_v27 }
 0x80c   : > { %2953 = vrot.lane.b32.xlu0 %v2952_v26, %s3210_s2 }
 0x80d   : > { %2958 = vrot.lane.b32.xlu1 %v2957_v30, %s3210_s2 }
 0x80f   : > { %v1857_v35 = vpop.permute.xlu1 %1856 }
 0x810   : > { %v3848_v39 = vsel %vm626_vm0, 0.0, %v1857_v35  ;;  %v1855_v40 = vpop.permute.xlu0 %1854 }
 0x811   : > { %v1886_v42 = vsel %vm1882_vm11, %v3848_v39, 0.0  ;;  %v3859_v47 = vsel %vm626_vm0, 0.0, %v1855_v40 }
 0x812   : > { %v2977_v44 = vpack.i.bf16 %v1709_v41, %v1886_v42  ;;  %v1885_v52 = vsel %vm1882_vm11, %v3859_v47, 0.0 }
 0x814   : > { %2978 = vrot.lane.b32.xlu0 %v2977_v44, %s3210_s2 }
 0x815   : > { %2963 = vrot.lane.b32.xlu1 %v2962_v45, %s3210_s2 }
 0x817   : > { %v1675_v49 = vpop.permute.xlu1 %1674 }
 0x818   : > { %v1851_v50 = vpop.permute.xlu0 %1850  ;;  %v3865_v51 = vsel %vm1698_vm8, 0.0, %v1675_v49 }
 0x819   : > { %v3870_v53 = vsel %vm626_vm0, 0.0, %v1851_v50  ;;  %v1708_v54 = vsel %vm1707_vm10, %v3865_v51, 0.0 }
 0x81a   : > { %v1883_v56 = vsel %vm1882_vm11, %v3870_v53, 0.0  ;;  %v2982_v57 = vpack.i.bf16 %v1708_v54, %v1885_v52  ;;  %v3007_v59 = vpack.i.bf16 %v1708_v54, %v1709_v41  ;;  %v1778_v54 = vld [vmem:[%s4132_s9 + $0x30] sm:$0xff] }
 0x81b   : > { %v2987_v58 = vpack.i.bf16 %v1883_v56, %v1884_v55  ;;  %v1779_v55 = vld [vmem:[%s4132_s9 + $0x38] sm:$0xff] }
 0x81c   : > { %2993 = vrot.lane.b32.xlu0 %v2957_v30, %s3209_s20  ;;  %v1926_v56 = vld [vmem:[#allocation4 + $0x18] sm:$0xff] }
 0x81d   : > { %2988 = vrot.lane.b32.xlu2 %v2987_v58, %s3210_s2  ;;  %2983 = vrot.lane.b32.xlu1 %v2982_v57, %s3210_s2  ;;  %v1956_v57 = vmul.u32 2, %v3487_v29 }
 0x81f   : > { %v1964_v58 = vadd.s32 1, %v1956_v57  ;;  %vm1958_vm14 = vcmp.eq.s32.totalorder %v3485_v28, %v1956_v57 }
 0x824   : > { %3008 = vrot.lane.b32.xlu0 %v3007_v59, %s3209_s20 }
 0x825   : > { %3003 = vrot.lane.b32.xlu2 %v3002_v60, %s3209_s20  ;;  %2998 = vrot.lane.b32.xlu1 %v2997_v61, %s3209_s20 }
 0x82c   : > { %2071 = vperm.xlu0 %2790, %v2061_v62  }
 0x82d   : > { %2076 = vperm.xlu2 %2789, %v2062_v63   ;;  %2081 = vperm.xlu1 %2791, %v2063_v0  }
 0x835   : > { %2066 = vperm.xlu1 %2791, %v2060_v1  }
 0x856   : > { %v2969_v3 = vpop.permute.xlu2 %2968 }
 0x857   : > { %v2970_v5 = vunpack.i.l.bf16 %v2969_v3  ;;  %v2971_v8 = vunpack.i.h.bf16 %v2969_v3 }
 0x859   : > { %1927 = vmatpush.msrb.mxu0 %v2970_v5 }
 0x85e   : > { %v2974_v18 = vpop.permute.xlu2 %2973 }
 0x85f   : > { %v2976_v24 = vunpack.i.h.bf16 %v2974_v18  ;;  %v2975_v25 = vunpack.i.l.bf16 %v2974_v18 }
 0x877   : > { %v2989_v35 = vpop.permute.xlu2 %2988 }
 0x878   : > { %v2990_v44 = vunpack.i.l.bf16 %v2989_v35  ;;  %v2991_v45 = vunpack.i.h.bf16 %v2989_v35 }
 0x87e   : > { %v2954_v7 = vpop.permute.xlu0 %2953 }
 0x87f   : > { %v2955_v9 = vunpack.i.l.bf16 %v2954_v7  ;;  %v2959_v10 = vpop.permute.xlu1 %2958  ;;  %v2956_v14 = vunpack.i.h.bf16 %v2954_v7  ;;  %v3004_v50 = vpop.permute.xlu2 %3003 }
 0x880   : > { %v2960_v12 = vunpack.i.l.bf16 %v2959_v10  ;;  %v2961_v13 = vunpack.i.h.bf16 %v2959_v10 }
 0x881   : > { %1928 = vmatpush.msrb.mxu0 %v2955_v9 }
 0x882   : > { %1792 = vmatpush.msrb.mxu3 %v2960_v12 }
 0x884   : > { %1793 = vmatpush.msrb.mxu3 %v2961_v13 }
 0x886   : > { %1794 = vmatpush.msrb.mxu3 %v2971_v8  ;;  %v2979_v15 = vpop.permute.xlu0 %2978 }
 0x887   : > { %v2964_v20 = vpop.permute.xlu1 %2963  ;;  %v2981_v26 = vunpack.i.h.bf16 %v2979_v15  ;;  %v2980_v27 = vunpack.i.l.bf16 %v2979_v15 }
 0x888   : > { %v2966_v21 = vunpack.i.h.bf16 %v2964_v20  ;;  %v2965_v22 = vunpack.i.l.bf16 %v2964_v20  ;;  %1795 = vmatpush.msrb.mxu3 %v2956_v14 }
 0x88a   : > { %1796 = vmatpush.msrb.mxu3 %v2966_v21  ;;  %1929 = vmatpush.msrb.mxu0 %v2965_v22 }
 0x88c   : > { %1797 = vmatpush.msrb.mxu3 %v2976_v24  ;;  %1930 = vmatpush.msrb.mxu0 %v2975_v25 }
 0x88e   : > { %1798 = vmatpush.msrb.mxu3 %v2981_v26  ;;  %1931 = vmatpush.msrb.mxu0 %v2980_v27  ;;  %v2994_v30 = vpop.permute.xlu0 %2993  ;;  %v2077_v26 = vpop.permute.xlu2 %2076 }
 0x88f   : > { %v2995_v36 = vunpack.i.l.bf16 %v2994_v30  ;;  %v2984_v40 = vpop.permute.xlu1 %2983  ;;  %v2996_v43 = vunpack.i.h.bf16 %v2994_v30 }
 0x890   : > { %v2986_v41 = vunpack.i.h.bf16 %v2984_v40  ;;  %v2985_v42 = vunpack.i.l.bf16 %v2984_v40 }
 0x891   : > { %1829 = vmatpush.msra.mxu1 %v2995_v36 }
 0x892   : > { %1799 = vmatpush.msrb.mxu3 %v2986_v41  ;;  %1932 = vmatpush.msrb.mxu0 %v2985_v42 }
 0x893   : > { %1830 = vmatpush.msra.mxu1 %v2996_v43 }
 0x894   : > { %2648 = vmatpush.msk.msrb.mxu3 %vm1707_vm10, %v3828_v23  ;;  %1933 = vmatpush.msrb.mxu0 %v2990_v44  ;;  %v3005_v23 = vunpack.i.l.bf16 %v3004_v50 }
 0x896   : > { %2649 = vmatpush.msk.msrb.mxu3 %vm1707_vm10, %v3818_v17  ;;  %1934 = vmatpush.msrb.mxu0 %v2991_v45  ;;  %v3009_v17 = vpop.permute.xlu0 %3008 }
 0x897   : > { %v2999_v46 = vpop.permute.xlu1 %2998 }
 0x898   : > { %v3000_v49 = vunpack.i.l.bf16 %v2999_v46  ;;  %2650 = vmatpush.msk.msrb.mxu3 %vm1707_vm10, %v3796_v4  ;;  %2660 = vmatpush.msk.msrb.mxu0 %vm1882_vm11, %v3793_v2  ;;  %v3001_v52 = vunpack.i.h.bf16 %v2999_v46  ;;  %v3006_v4 = vunpack.i.h.bf16 %v3004_v50  ;;  %v3010_v2 = vunpack.i.l.bf16 %v3009_v17 }
 0x89a   : > { %2651 = vmatpush.msk.msrb.mxu3 %vm1707_vm10, %v3815_v16  ;;  %1831 = vmatpush.msra.mxu1 %v3000_v49  ;;  %v1772_v16 = vld [vmem:[%s4132_s9] sm:$0xff] }
 0x89b   : > { %2661 = vmatpush.msk.msrb.mxu0 %vm1882_vm11, %v3821_v19  ;;  %v1957_v19 = vmul.u32 2, %v3497_v37  ;;  %v1923_v37 = vld [vmem:[#allocation4] sm:$0xff] }
 0x89c   : > { %2652 = vmatpush.msk.msrb.mxu3 %vm1707_vm10, %v3843_v34  ;;  %1832 = vmatpush.msra.mxu1 %v3001_v52  ;;  %v1774_v34 = vld [vmem:[%s4132_s9 + $0x10] sm:$0xff] }
 0x89d   : > { %2662 = vmatpush.msk.msrb.mxu0 %vm1882_vm11, %v3836_v31  ;;  %v3011_v31 = vunpack.i.h.bf16 %v3009_v17  ;;  %vm1959_vm13 = vcmp.eq.s32.totalorder %v3485_v28, %v1957_v19 }
 0x89e   : > { %2653 = vmatpush.msk.msrb.mxu3 %vm1707_vm10, %v3806_v11  ;;  %1833 = vmatpush.msra.mxu1 %v3005_v23  ;;  %v1965_v11 = vadd.s32 1, %v1957_v19  ;;  %v2669_v59 = vsel %vm1959_vm13, 1.0, %v3213_v33  ;;  %v2072_v20 = vpop.permute.xlu0 %2071 }
 0x89f   : > { %2663 = vmatpush.msk.msrb.mxu0 %vm1882_vm11, %v3803_v6  ;;  %v1773_v6 = vld [vmem:[%s4132_s9 + $0x8] sm:$0xff]  ;;  %v2082_v35 = vpop.permute.xlu1 %2081 }
 0x8a0   : > { %2654 = vmatpush.msk.msrb.mxu3 %vm1707_vm10, %v3840_v32  ;;  %1834 = vmatpush.msra.mxu1 %v3006_v4  ;;  %vm1967_vm12 = vcmp.eq.s32.totalorder %v3485_v28, %v1965_v11 }
 0x8a1   : > { %2664 = vmatpush.msk.msrb.mxu0 %vm1882_vm11, %v3848_v39  ;;  %v2671_v32 = vsel %vm1967_vm12, 1.0, %v3213_v33  ;;  %v1775_v39 = vld [vmem:[%s4132_s9 + $0x18] sm:$0xff] }
 0x8a2   : > { %2655 = vmatpush.msk.msrb.mxu3 %vm1707_vm10, %v3865_v51  ;;  %1835 = vmatpush.msra.mxu1 %v3010_v2  ;;  %v1777_v51 = vld [vmem:[%s4132_s9 + $0x28] sm:$0xff] }
 0x8a3   : > { %2665 = vmatpush.msk.msrb.mxu0 %vm1882_vm11, %v3859_v47  ;;  %1808 = vmatmul.f32.vlgmr.msrb.gmra.mxu3 %v1772_v16  ;;  %v1924_v47 = vld [vmem:[#allocation4 + $0x8] sm:$0xff] }
 0x8a4   : > { %1836 = vmatpush.msra.mxu1 %v3011_v31  ;;  %2672 = vmatpush.msk.msra.mxu3 %vm647_vm4, %v2671_v32  ;;  %vm1966_vm4 = vcmp.eq.s32.totalorder %v3485_v28, %v1964_v58  ;;  %v2174_v32 = vld [vmem:[%s4136_s13 + $0x8] sm:$0xff] }
 0x8a5   : > { %2666 = vmatpush.msk.msrb.mxu0 %vm1882_vm11, %v3862_v48  ;;  %2656 = vmatmul.msk.f32.vlgmr.msra.gmra.mxu1 %vm1510_vm7, %v1773_v6  ;;  %v1776_v48 = vld [vmem:[%s4132_s9 + $0x20] sm:$0xff] }
 0x8a6   : > { %2673 = vmatpush.msk.msra.mxu3 %vm1966_vm4, %v3214_v38  ;;  %2678 = vmatpush.msk.msrb.mxu1 %vm653_vm3, %v2669_v59  ;;  %vm2108_vm3 = vcmask 195584  }
 0x8a7   : > { %2667 = vmatpush.msk.msrb.mxu0 %vm1882_vm11, %v3870_v53  ;;  %v1925_v53 = vld [vmem:[#allocation4 + $0x10] sm:$0xff]  ;;  %v2067_v43 = vpop.permute.xlu1 %2066 }
 0x8a8   : > { %1943 = vmatmul.f32.vlgmr.msrb.gmra.mxu0 %v1923_v37  ;;  %2679 = vmatpush.msk.msrb.mxu1 %vm1958_vm14, %v3214_v38  ;;  %v2176_v37 = vld [vmem:[%s4136_s13 + $0x18] sm:$0xff] }
 0x8ab   : > { %1811 = vmatmul.f32.gmra.mxu3 %v1774_v34  ;;  %v2173_v34 = vld [vmem:[%s4136_s13] sm:$0xff] }
 0x8ad   : > { %2657 = vmatmul.msk.f32.gmra.mxu1 %vm1510_vm7, %v1775_v39  ;;  %v2175_v39 = vld [vmem:[%s4136_s13 + $0x10] sm:$0xff] }
 0x8b0   : > { %1946 = vmatmul.f32.gmra.mxu0 %v1924_v47 }
 0x8b3   : > { %1814 = vmatmul.f32.gmra.mxu3 %v1776_v48 }
 0x8b5   : > { %2658 = vmatmul.msk.f32.gmra.mxu1 %vm1510_vm7, %v1777_v51 }
 0x8b8   : > { %1949 = vmatmul.f32.gmra.mxu0 %v1925_v53 }
 0x8bb   : > { %1817 = vmatmul.f32.gmra.mxu3 %v1778_v54 }
 0x8bd   : > { %2659 = vmatmul.msk.f32.gmra.mxu1 %vm1510_vm7, %v1779_v55 }
 0x8c0   : > { %1952 = vmatmul.f32.gmra.mxu0 %v1926_v56 }
 0x922   : > { %v1838_v60 = vpop.f32.mrf.mxu1 }
 0x925   : > { %v1944_v61 = vpop.f32.mrf.mxu0 }
 0x926   : > { %2674 = vmatmul.msk.f32.vlgmr.msra.gmra.mxu3 %vm1882_vm11, %v1944_v61  ;;  %v1809_v29 = vpop.f32.mrf.mxu3 }
 0x927   : > { %v1839_v62 = vadd.f32 %v1838_v60, %v1809_v29 }
 0x929   : > { %2680 = vmatmul.msk.f32.vlgmr.msrb.gmra.mxu1 %vm1707_vm10, %v1839_v62 }
 0x92a   : > { %v1841_v63 = vpop.f32.mrf.mxu1 }
 0x92d   : > { %v1947_v0 = vpop.f32.mrf.mxu0 }
 0x92e   : > { %2675 = vmatmul.msk.f32.gmra.mxu3 %vm1882_vm11, %v1947_v0  ;;  %v1812_v1 = vpop.f32.mrf.mxu3 }
 0x92f   : > { %v1842_v33 = vadd.f32 %v1841_v63, %v1812_v1 }
 0x931   : > { %2681 = vmatmul.msk.f32.gmra.mxu1 %vm1707_vm10, %v1842_v33 }
 0x932   : > { %v1844_v28 = vpop.f32.mrf.mxu1 }
 0x935   : > { %v1950_v3 = vpop.f32.mrf.mxu0 }
 0x936   : > { %2676 = vmatmul.msk.f32.gmra.mxu3 %vm1882_vm11, %v1950_v3  ;;  %v1815_v38 = vpop.f32.mrf.mxu3 }
 0x937   : > { %v1845_v5 = vadd.f32 %v1844_v28, %v1815_v38 }
 0x939   : > { %2682 = vmatmul.msk.f32.gmra.mxu1 %vm1707_vm10, %v1845_v5 }
 0x93a   : > { %v1847_v7 = vpop.f32.mrf.mxu1 }
 0x93d   : > { %v1953_v9 = vpop.f32.mrf.mxu0 }
 0x93e   : > { %2677 = vmatmul.msk.f32.gmra.mxu3 %vm1882_vm11, %v1953_v9  ;;  %v1818_v10 = vpop.f32.mrf.mxu3 }
 0x93f   : > { %v1848_v12 = vadd.f32 %v1847_v7, %v1818_v10  ;;  %v2166_v10 = vld [vmem:[%s4135_s12 + $0x8] sm:$0xff] }
 0x941   : > { %2683 = vmatmul.msk.f32.gmra.mxu1 %vm1707_vm10, %v1848_v12  ;;  %v2165_v12 = vld [vmem:[%s4135_s12] sm:$0xff] }
 0x9a6   : > { %v2048_v13 = vpop.f32.mrf.mxu1 }
 0x9a9   : > { %v2004_v8 = vpop.f32.mrf.mxu3 }
 0x9aa   : > { %v2049_v42 = vadd.f32 %v2048_v13, %v2004_v8  ;;  %v2168_v13 = vld [vmem:[%s4135_s12 + $0x18] sm:$0xff]  ;;  %v2167_v8 = vld [vmem:[%s4135_s12 + $0x10] sm:$0xff] }
 0x9ac   : > { %v2084_v44 = vadd.f32 %v2067_v43, %v2049_v42 }
 0x9ae   : > { %v2051_v14 = vpop.f32.mrf.mxu1 }
 0x9b1   : > { %v2007_v15 = vpop.f32.mrf.mxu3 }
 0x9b2   : > { %v2052_v18 = vadd.f32 %v2051_v14, %v2007_v15  ;;  %v2170_v14 = vld [vmem:[%s4135_s12 + $0x28] sm:$0xff]  ;;  %v2169_v15 = vld [vmem:[%s4135_s12 + $0x20] sm:$0xff] }
 0x9b4   : > { %v2085_v21 = vadd.f32 %v2072_v20, %v2052_v18  ;;  %v2172_v18 = vld [vmem:[%s4135_s12 + $0x38] sm:$0xff]  ;;  %v2171_v20 = vld [vmem:[%s4135_s12 + $0x30] sm:$0xff] }
 0x9b6   : > { %2094 = vrot.lane.b32.xlu1 %v2085_v21, %s3207_s30  ;;  %v2054_v22 = vpop.f32.mrf.mxu1 }
 0x9b9   : > { %v2010_v24 = vpop.f32.mrf.mxu3 }
 0x9ba   : > { %v2055_v25 = vadd.f32 %v2054_v22, %v2010_v24 }
 0x9bc   : > { %v2086_v27 = vadd.f32 %v2077_v26, %v2055_v25 }
 0x9be   : > { %2096 = vrot.lane.b32.xlu0 %v2086_v27, %s3207_s30  ;;  %v2057_v30 = vpop.f32.mrf.mxu1 }
 0x9c1   : > { %v2013_v36 = vpop.f32.mrf.mxu3 }
 0x9c2   : > { %v2058_v40 = vadd.f32 %v2057_v30, %v2013_v36 }
 0x9c4   : > { %v2087_v41 = vadd.f32 %v2082_v35, %v2058_v40 }
 0x9c6   : > { %2098 = vrot.lane.b32.xlu2 %v2087_v41, %s3207_s30 }
 0x9ce   : > { %2092 = vrot.lane.b32.xlu2 %v2084_v44, %s3207_s30 }
 0xa20   : > { %v2099_v45 = vpop.permute.xlu2 %2098 }
 0xa21   : > { %v3992_v2 = vsel %vm626_vm0, 0.0, %v2099_v45 }
 0xa22   : > { %v2112_v31 = vsel %vm2108_vm3, %v3992_v2, 0.0 }
 0xa28   : > { %v2095_v46 = vpop.permute.xlu1 %2094  ;;  %v2093_v49 = vpop.permute.xlu2 %2092 }
 0xa29   : > { %v3981_v50 = vsel %vm626_vm0, 0.0, %v2095_v46  ;;  %v3984_v52 = vsel %vm626_vm0, 0.0, %v2093_v49 }
 0xa2a   : > { %v2110_v23 = vsel %vm2108_vm3, %v3981_v50, 0.0  ;;  %v2109_v17 = vsel %vm2108_vm3, %v3984_v52, 0.0 }
 0xa2b   : > { %v3017_v4 = vpack.i.bf16 %v2109_v17, %v2110_v23 }
 0xa2d   : > { %3018 = vrot.lane.b32.xlu1 %v3017_v4, %s3208_s19 }
 0xa30   : > { %v2097_v16 = vpop.permute.xlu0 %2096 }
 0xa31   : > { %v2106_v19 = vsel %vm626_vm0, 0.0, %v2097_v16 }
 0xa32   : > { %v2111_v6 = vsel %vm2108_vm3, %v2106_v19, 0.0 }
 0xa33   : > { %v3022_v11 = vpack.i.bf16 %v2111_v6, %v2112_v31 }
 0xa35   : > { %3023 = vrot.lane.b32.xlu2 %v3022_v11, %s3209_s20  ;;  %3013 = vrot.lane.b32.xlu0 %v3022_v11, %s3208_s19 }
 0xa36   : > { %3038 = vrot.lane.b32.xlu1 %v3022_v11, %s3210_s2 }
 0xa3d   : > { %3033 = vrot.lane.b32.xlu2 %v3017_v4, %s3210_s2  ;;  %3028 = vrot.lane.b32.xlu0 %v3017_v4, %s3209_s20 }
 0xa3e   : > { %3048 = vrot.lane.b32.xlu1 %v3017_v4, %s3211_s23 }
 0xa45   : > { %2194 = vperm.xlu2 %2789, %v2176_v37   ;;  %3043 = vrot.lane.b32.xlu0 %v3022_v11, %s3211_s23 }
 0xa46   : > { %2184 = vperm.xlu1 %2791, %v2174_v32  }
 0xa4d   : > { %2179 = vperm.xlu2 %2789, %v2173_v34   ;;  %2189 = vperm.xlu0 %2790, %v2175_v39  }
 0xa8f   : > { %v3024_v55 = vpop.permute.xlu2 %3023 }
 0xa90   : > { %v3025_v59 = vunpack.i.l.bf16 %v3024_v55  ;;  %v3026_v60 = vunpack.i.h.bf16 %v3024_v55 }
 0xa97   : > { %v3034_v1 = vpop.permute.xlu2 %3033 }
 0xa98   : > { %v3035_v38 = vunpack.i.l.bf16 %v3034_v1  ;;  %v3036_v7 = vunpack.i.h.bf16 %v3034_v1 }
 0xa9f   : > { %v3019_v47 = vpop.permute.xlu1 %3018  ;;  %v2195_v43 = vpop.permute.xlu2 %2194 }
 0xaa0   : > { %v3020_v54 = vunpack.i.l.bf16 %v3019_v47  ;;  %v3021_v56 = vunpack.i.h.bf16 %v3019_v47 }
 0xaa7   : > { %v3014_v48 = vpop.permute.xlu0 %3013  ;;  %v2180_v23 = vpop.permute.xlu2 %2179 }
 0xaa8   : > { %v3015_v51 = vunpack.i.l.bf16 %v3014_v48  ;;  %v3016_v53 = vunpack.i.h.bf16 %v3014_v48  ;;  %v3039_v57 = vpop.permute.xlu1 %3038 }
 0xaa9   : > { %v3040_v63 = vunpack.i.l.bf16 %v3039_v57  ;;  %v3041_v28 = vunpack.i.h.bf16 %v3039_v57  ;;  %v2356_v57 = vld [vmem:[%s4138_s15] sm:$0xff] }
 0xaaa   : > { %2209 = vmatpush.msra.mxu0 %v3015_v51 }
 0xaac   : > { %2210 = vmatpush.msra.mxu0 %v3016_v53 }
 0xaae   : > { %2211 = vmatpush.msra.mxu0 %v3020_v54 }
 0xaaf   : > { %v3029_v58 = vpop.permute.xlu0 %3028 }
 0xab0   : > { %2212 = vmatpush.msra.mxu0 %v3021_v56  ;;  %v3030_v61 = vunpack.i.l.bf16 %v3029_v58  ;;  %v3031_v29 = vunpack.i.h.bf16 %v3029_v58  ;;  %v3049_v33 = vpop.permute.xlu1 %3048  ;;  %v2359_v56 = vld [vmem:[%s4138_s15 + $0x18] sm:$0xff]  ;;  %v2358_v58 = vld [vmem:[%s4138_s15 + $0x10] sm:$0xff] }
 0xab1   : > { %v3050_v5 = vunpack.i.l.bf16 %v3049_v33  ;;  %v3051_v9 = vunpack.i.h.bf16 %v3049_v33 }
 0xab2   : > { %2213 = vmatpush.msra.mxu0 %v3025_v59  ;;  %v2455_v59 = vld [vmem:[%s4140_s17] sm:$0x7] }
 0xab4   : > { %2214 = vmatpush.msra.mxu0 %v3026_v60  ;;  %v2357_v60 = vld [vmem:[%s4138_s15 + $0x8] sm:$0xff] }
 0xab6   : > { %2215 = vmatpush.msra.mxu0 %v3030_v61 }
 0xab7   : > { %v3044_v62 = vpop.permute.xlu0 %3043 }
 0xab8   : > { %v3045_v0 = vunpack.i.l.bf16 %v3044_v62  ;;  %2216 = vmatpush.msra.mxu0 %v3031_v29  ;;  %v3046_v3 = vunpack.i.h.bf16 %v3044_v62  ;;  %v2185_v25 = vpop.permute.xlu1 %2184 }
 0xaba   : > { %2217 = vmatpush.msra.mxu0 %v3040_v63  ;;  %2250 = vmatpush.msra.mxu2 %v3045_v0 }
 0xabc   : > { %2218 = vmatpush.msra.mxu0 %v3041_v28  ;;  %2251 = vmatpush.msra.mxu2 %v3046_v3 }
 0xabe   : > { %2219 = vmatpush.msra.mxu0 %v3035_v38  ;;  %2252 = vmatpush.msra.mxu2 %v3050_v5 }
 0xabf   : > { %v2190_v40 = vpop.permute.xlu0 %2189 }
 0xac0   : > { %2220 = vmatpush.msra.mxu0 %v3036_v7  ;;  %2253 = vmatpush.msra.mxu2 %v3051_v9 }
 0xac1   : > { %2688 = vmatmul.msk.f32.vlgmr.msra.gmra.mxu2 %vm842_vm9, %v2166_v10 }
 0xac2   : > { %2684 = vmatpush.msk.msra.mxu0 %vm2108_vm3, %v3992_v2 }
 0xac4   : > { %2685 = vmatpush.msk.msra.mxu0 %vm2108_vm3, %v2106_v19 }
 0xac6   : > { %2686 = vmatpush.msk.msra.mxu0 %vm2108_vm3, %v3981_v50 }
 0xac8   : > { %2687 = vmatpush.msk.msra.mxu0 %vm2108_vm3, %v3984_v52 }
 0xac9   : > { %2225 = vmatmul.f32.vlgmr.msra.gmra.mxu0 %v2165_v12  ;;  %2689 = vmatmul.msk.f32.gmra.mxu2 %vm842_vm9, %v2168_v13 }
 0xad1   : > { %2228 = vmatmul.f32.gmra.mxu0 %v2167_v8  ;;  %2690 = vmatmul.msk.f32.gmra.mxu2 %vm842_vm9, %v2170_v14 }
 0xad9   : > { %2231 = vmatmul.f32.gmra.mxu0 %v2169_v15  ;;  %2691 = vmatmul.msk.f32.gmra.mxu2 %vm842_vm9, %v2172_v18 }
 0xae1   : > { %2234 = vmatmul.f32.gmra.mxu0 %v2171_v20 }
 0xb44   : > { %v2255_v21 = vpop.f32.mrf.mxu2 }
 0xb46   : > { %v2226_v22 = vpop.f32.mrf.mxu0 }
 0xb47   : > { %v2227_v17 = vadd.f32 %v2226_v22, %v2180_v23 }
 0xb49   : > { %v2256_v2 = vadd.f32 %v2255_v21, %v2227_v17 }
 0xb4b   : > { %v2267_v16 = vmax.f32 %v2256_v2, 0.0 }
 0xb4c   : > { %v2258_v24 = vpop.f32.mrf.mxu2 }
 0xb4e   : > { %v2229_v26 = vpop.f32.mrf.mxu0 }
 0xb4f   : > { %v2230_v27 = vadd.f32 %v2229_v26, %v2185_v25  ;;  %v2349_v25 = vld [vmem:[#allocation6 + $0x8] sm:$0xff]  ;;  %v2348_v26 = vld [vmem:[#allocation6] sm:$0xff] }
 0xb51   : > { %v2259_v30 = vadd.f32 %v2258_v24, %v2230_v27  ;;  %v2351_v27 = vld [vmem:[#allocation6 + $0x18] sm:$0xff] }
 0xb53   : > { %v2268_v35 = vmax.f32 %v2259_v30, 0.0  ;;  %v2350_v30 = vld [vmem:[#allocation6 + $0x10] sm:$0xff] }
 0xb54   : > { %v2261_v36 = vpop.f32.mrf.mxu2 }
 0xb55   : > { %2277 = vrot.lane.b32.xlu2 %v2268_v35, %s3207_s30  ;;  %v2353_v35 = vld [vmem:[#allocation6 + $0x28] sm:$0xff] }
 0xb56   : > { %v2232_v41 = vpop.f32.mrf.mxu0 }
 0xb57   : > { %v2233_v42 = vadd.f32 %v2232_v41, %v2190_v40  ;;  %v2355_v40 = vld [vmem:[#allocation6 + $0x38] sm:$0xff]  ;;  %v2354_v41 = vld [vmem:[#allocation6 + $0x30] sm:$0xff] }
 0xb59   : > { %v2262_v44 = vadd.f32 %v2261_v36, %v2233_v42  ;;  %v2352_v36 = vld [vmem:[#allocation6 + $0x20] sm:$0xff] }
 0xb5b   : > { %v2269_v45 = vmax.f32 %v2262_v44, 0.0 }
 0xb5c   : > { %v2264_v49 = vpop.f32.mrf.mxu2 }
 0xb5d   : > { %2279 = vrot.lane.b32.xlu1 %v2269_v45, %s3207_s30 }
 0xb5e   : > { %v2235_v46 = vpop.f32.mrf.mxu0 }
 0xb5f   : > { %v2236_v50 = vadd.f32 %v2235_v46, %v2195_v43 }
 0xb61   : > { %v2265_v52 = vadd.f32 %v2264_v49, %v2236_v50 }
 0xb63   : > { %v2270_v4 = vmax.f32 %v2265_v52, 0.0 }
 0xb65   : > { %2281 = vrot.lane.b32.xlu0 %v2270_v4, %s3207_s30 }
 0xb6d   : > { %2275 = vrot.lane.b32.xlu0 %v2267_v16, %s3207_s30  ;;  %s4161_s30 = sld [smem:[#allocation16_spill]] }
 0xb73   : > { %s620_s29 = scalar_lea.vmem %s4161_s30, %s2581_s7 }
 0xbaf   : > { %v2278_v39 = vpop.permute.xlu2 %2277 }
 0xbb0   : > { %v4069_v47 = vsel %vm626_vm0, 0.0, %v2278_v39 }
 0xbb1   : > { %v2293_v53 = vsel %vm2291_vm15, %v4069_v47, 0.0 }
 0xbcf   : > { %v2280_v19 = vpop.permute.xlu1 %2279 }
 0xbd0   : > { %v4057_v31 = vsel %vm626_vm0, 0.0, %v2280_v19 }
 0xbd1   : > { %v2294_v37 = vsel %vm2291_vm15, %v4057_v31, 0.0 }
 0xbd7   : > { %v2282_v6 = vpop.permute.xlu0 %2281 }
 0xbd8   : > { %v4060_v11 = vsel %vm626_vm0, 0.0, %v2282_v6 }
 0xbd9   : > { %v2295_v32 = vsel %vm2291_vm15, %v4060_v11, 0.0 }
 0xbda   : > { %v3052_v34 = vpack.i.bf16 %v2294_v37, %v2295_v32 }
 0xbdc   : > { %3053 = vrot.lane.b32.xlu1 %v3052_v34, %s3208_s19  ;;  %3063 = vrot.lane.b32.xlu0 %v3052_v34, %s3209_s20 }
 0xbdf   : > { %v2276_v48 = vpop.permute.xlu0 %2275 }
 0xbe0   : > { %v4072_v51 = vsel %vm626_vm0, 0.0, %v2276_v48  ;;  %vm2484_vm0 = vcmask 149504  }
 0xbe1   : > { %v2292_v54 = vsel %vm2291_vm15, %v4072_v51, 0.0 }
 0xbe2   : > { %v3077_v55 = vpack.i.bf16 %v2292_v54, %v2293_v53  ;;  %v2454_v53 = vld [vmem:[%s4160_s24] sm:$0x7] }
 0xbe4   : > { %3078 = vrot.lane.b32.xlu0 %v3077_v55, %s3210_s2  ;;  %3068 = vrot.lane.b32.xlu1 %v3077_v55, %s3209_s20 }
 0xbe5   : > { %3058 = vrot.lane.b32.xlu2 %v3077_v55, %s3208_s19 }
 0xbec   : > { %2377 = vperm.xlu0 %2790, %v2359_v56   ;;  %3083 = vrot.lane.b32.xlu1 %v3052_v34, %s3211_s23 }
 0xbed   : > { %3073 = vrot.lane.b32.xlu2 %v3052_v34, %s3210_s2 }
 0xbf4   : > { %2362 = vperm.xlu0 %2790, %v2356_v57   ;;  %2372 = vperm.xlu1 %2791, %v2358_v58  }
 0xbf5   : > { %3088 = vrot.lane.b32.xlu2 %v3077_v55, %s3211_s23 }
 0xbfc   : > { %2458 = vperm.xlu1 %2791, %v2455_v59  }
 0xbfd   : > { %2367 = vperm.xlu2 %2789, %v2357_v60  }
 0xc3f   : > { %v3059_v61 = vpop.permute.xlu2 %3058 }
 0xc40   : > { %v3060_v0 = vunpack.i.l.bf16 %v3059_v61  ;;  %v3061_v33 = vunpack.i.h.bf16 %v3059_v61 }
 0xc47   : > { %v3074_v28 = vpop.permute.xlu2 %3073 }
 0xc48   : > { %v3075_v12 = vunpack.i.l.bf16 %v3074_v28  ;;  %v3076_v15 = vunpack.i.h.bf16 %v3074_v28 }
 0xc4e   : > { %v3054_v29 = vpop.permute.xlu1 %3053  ;;  %v3064_v1 = vpop.permute.xlu0 %3063 }
 0xc4f   : > { %v3055_v62 = vunpack.i.l.bf16 %v3054_v29  ;;  %v3056_v63 = vunpack.i.h.bf16 %v3054_v29  ;;  %v3065_v38 = vunpack.i.l.bf16 %v3064_v1  ;;  %v3066_v5 = vunpack.i.h.bf16 %v3064_v1  ;;  %v3089_v8 = vpop.permute.xlu2 %3088 }
 0xc50   : > { %v3090_v20 = vunpack.i.l.bf16 %v3089_v8  ;;  %v3091_v22 = vunpack.i.h.bf16 %v3089_v8 }
 0xc51   : > { %2392 = vmatpush.msrb.mxu3 %v3055_v62 }
 0xc53   : > { %2393 = vmatpush.msrb.mxu3 %v3056_v63 }
 0xc55   : > { %2394 = vmatpush.msrb.mxu3 %v3060_v0 }
 0xc56   : > { %v3069_v3 = vpop.permute.xlu1 %3068  ;;  %v3079_v14 = vpop.permute.xlu0 %3078 }
 0xc57   : > { %2395 = vmatpush.msrb.mxu3 %v3061_v33  ;;  %v3070_v7 = vunpack.i.l.bf16 %v3069_v3  ;;  %v3071_v9 = vunpack.i.h.bf16 %v3069_v3  ;;  %v3080_v21 = vunpack.i.l.bf16 %v3079_v14  ;;  %v3081_v24 = vunpack.i.h.bf16 %v3079_v14  ;;  %v2368_v23 = vpop.permute.xlu2 %2367 }
 0xc59   : > { %2396 = vmatpush.msrb.mxu3 %v3065_v38 }
 0xc5b   : > { %2397 = vmatpush.msrb.mxu3 %v3066_v5 }
 0xc5d   : > { %2398 = vmatpush.msrb.mxu3 %v3070_v7 }
 0xc5e   : > { %v3084_v10 = vpop.permute.xlu1 %3083  ;;  %v2378_v49 = vpop.permute.xlu0 %2377 }
 0xc5f   : > { %v3085_v13 = vunpack.i.l.bf16 %v3084_v10  ;;  %2399 = vmatpush.msrb.mxu3 %v3071_v9  ;;  %v3086_v18 = vunpack.i.h.bf16 %v3084_v10 }
 0xc61   : > { %2400 = vmatpush.msrb.mxu3 %v3075_v12  ;;  %2433 = vmatpush.msra.mxu1 %v3085_v13 }
 0xc63   : > { %2401 = vmatpush.msrb.mxu3 %v3076_v15  ;;  %2434 = vmatpush.msra.mxu1 %v3086_v18 }
 0xc65   : > { %2402 = vmatpush.msrb.mxu3 %v3080_v21  ;;  %2435 = vmatpush.msra.mxu1 %v3090_v20 }
 0xc66   : > { %v2373_v52 = vpop.permute.xlu1 %2372 }
 0xc67   : > { %2403 = vmatpush.msrb.mxu3 %v3081_v24  ;;  %2436 = vmatpush.msra.mxu1 %v3091_v22 }
 0xc68   : > { %2696 = vmatmul.msk.f32.vlgmr.msra.gmra.mxu1 %vm842_vm9, %v2349_v25 }
 0xc69   : > { %2692 = vmatpush.msk.msrb.mxu3 %vm2291_vm15, %v4060_v11 }
 0xc6b   : > { %2693 = vmatpush.msk.msrb.mxu3 %vm2291_vm15, %v4057_v31  ;;  %v2363_v31 = vpop.permute.xlu0 %2362 }
 0xc6d   : > { %2694 = vmatpush.msk.msrb.mxu3 %vm2291_vm15, %v4069_v47 }
 0xc6e   : > { %v2459_v54 = vpop.permute.xlu1 %2458 }
 0xc6f   : > { %2695 = vmatpush.msk.msrb.mxu3 %vm2291_vm15, %v4072_v51 }
 0xc70   : > { %2408 = vmatmul.f32.vlgmr.msrb.gmra.mxu3 %v2348_v26  ;;  %2697 = vmatmul.msk.f32.gmra.mxu1 %vm842_vm9, %v2351_v27 }
 0xc78   : > { %2411 = vmatmul.f32.gmra.mxu3 %v2350_v30  ;;  %2698 = vmatmul.msk.f32.gmra.mxu1 %vm842_vm9, %v2353_v35 }
 0xc80   : > { %2414 = vmatmul.f32.gmra.mxu3 %v2352_v36  ;;  %2699 = vmatmul.msk.f32.gmra.mxu1 %vm842_vm9, %v2355_v40 }
 0xc88   : > { %2417 = vmatmul.f32.gmra.mxu3 %v2354_v41 }
 0xce5   : > { %v2438_v42 = vpop.f32.mrf.mxu1 }
 0xced   : > { %v2441_v44 = vpop.f32.mrf.mxu1 }
 0xcf3   : > { %v2409_v43 = vpop.f32.mrf.mxu3 }
 0xcf4   : > { %v2410_v6 = vadd.f32 %v2409_v43, %v2363_v31 }
 0xcf5   : > { %v2444_v46 = vpop.f32.mrf.mxu1 }
 0xcf6   : > { %v2439_v39 = vadd.f32 %v2438_v42, %v2410_v6 }
 0xcf8   : > { %v2450_v51 = vmax.f32 %v2439_v39, 0.0 }
 0xcfb   : > { %v2412_v45 = vpop.f32.mrf.mxu3 }
 0xcfc   : > { %v2413_v16 = vadd.f32 %v2412_v45, %v2368_v23 }
 0xcfd   : > { %v2447_v2 = vpop.f32.mrf.mxu1 }
 0xcfe   : > { %v2442_v32 = vadd.f32 %v2441_v44, %v2413_v16 }
 0xd00   : > { %v2451_v48 = vmax.f32 %v2442_v32, 0.0 }
 0xd03   : > { %v2415_v50 = vpop.f32.mrf.mxu3 }
 0xd04   : > { %v2416_v17 = vadd.f32 %v2415_v50, %v2373_v52 }
 0xd06   : > { %v2445_v11 = vadd.f32 %v2444_v46, %v2416_v17 }
 0xd08   : > { %v2452_v47 = vmax.f32 %v2445_v11, 0.0 }
 0xd0b   : > { %v2418_v4 = vpop.f32.mrf.mxu3 }
 0xd0c   : > { %v2419_v19 = vadd.f32 %v2418_v4, %v2378_v49 }
 0xd0e   : > { %v2448_v37 = vadd.f32 %v2447_v2, %v2419_v19 }
 0xd10   : > { %v2453_v34 = vmax.f32 %v2448_v37, 0.0 }
 0xd12   : > { %2476 = vmatpush.msrb.mxu0 %v2453_v34 }
 0xd14   : > { %2477 = vmatpush.msrb.mxu0 %v2452_v47 }
 0xd16   : > { %2478 = vmatpush.msrb.mxu0 %v2451_v48 }
 0xd18   : > { %2479 = vmatpush.msrb.mxu0 %v2450_v51 }
 0xd19   : > { %2700 = vmatmul.msk.f32.vlgmr.msrb.gmra.mxu0 %vm842_vm9, %v2454_v53 }
 0xd96   : > { %v2481_v55 = vpop.f32.mrf.mxu0 }
 0xd97   : > { %v2482_v56 = vadd.f32 %v2481_v55, %v2459_v54 }
 0xd99   : > { %2485 = vst.msk [vmem:[%s620_s29] sm:$0x7] %vm2484_vm0, %v2482_v56 }
 0xd9a PF: > { %s4162_s1 = sld [smem:[#allocation9_spill]] }
 0xda0   : > { %s30_s27 = sadd.s32 1, %s4162_s1  }
 0xda1   : > { %p27_p7 = scmp.ge.s32.totalorder %s30_s27, 4  }
 0xda3   :  { %29 = sbr.rel (!%p27_p7) target bundleno = 10 (0xa), region = 135 }
 0xda8   :  { %2505 = vsyncpa [#allocation3], 1 }
 0xda9   :  { %2507 = vsyncpa [#allocation3 + $0x1], 1 }
 0xdaa   :  { %2508 = vsyncpa [#allocation5], 1 }

</bundles_post_ra>
